<compile_context>
chip_gen: v7x
topology: tpu7x:2x2x1
jax: 0.10.0
libtpu: 0.0.40
codegen_flags: <defaults>
</compile_context>

<pallas_src>
import jax
import jax.numpy as jnp
from jax.experimental import pallas as pl
from jax.experimental.pallas import tpu as pltpu

FEATURE_DIM = 13                 # synthetic encoder output channels
IN_DIM = FEATURE_DIM + 3         # decoder input dim (features + xyz)
WIDTH = 32                       # decoder_width
OUT_DIM = 1

# Resident weight pack: (8, 32, 32)
#   slot 0: column pack C (each used column is a (32,1) vector):
#       0: (w_e@w1[:F])^T  1: (b_e@w1[:F])^T  2: b1^T  3..5: w1[F..F+2]^T
#       6: b2^T  7: b3^T  8: b4^T(padded)
#       9: (w_e@v1[:F])^T 10: (b_e@v1[:F])^T 11: c1^T 12..14: v1[F..F+2]^T
#      15: c2^T 16: c3^T 17: (unused) 18: c4 at row 0   rest: 0
#   slots 1..6: w2^T, w3^T, w4^T(pad rows), v1^T(pad cols), v2^T, v3^T
#   slot 7: row 0 = v4^T, rest 0
_N_SLOTS = 8

# Point-stream pack rows: [x0, x1, x2, gathered, wsum, 0, 0, 0]
_N_PT_ROWS = 8


# --------------------------------------------------------------------------
# Pallas kernel: fully fused MLP_decoder (+ folded pointwise-encoder affine),
# transposed (feature-on-sublane, point-on-lane) layout.
# --------------------------------------------------------------------------
def _decoder_kernel(pts_ref, w_ref, o_ref):
    P = pts_ref[...]                         # (8, T) packed point stream
    x0, x1, x2 = P[0:1], P[1:2], P[2:3]      # (1, T) HR coordinates
    g, ws = P[3:4], P[4:5]                   # gathered LR intensity / weight sum

    # Hoist all resident weight slots once per grid step.
    C = w_ref[0]                             # (32, 32) column pack
    W2t, W3t, W4t = w_ref[1], w_ref[2], w_ref[3]
    V1t, V2t, V3t = w_ref[4], w_ref[5], w_ref[6]
    V4row = w_ref[7]                         # row 0 = v4^T (1, 32)

    def dot(a, b):
        return jnp.dot(a, b, preferred_element_type=jnp.float32)

    def col(j):
        return C[:, j:j + 1]                 # (32, 1)

    def first_layer(a, bg, b, w):
        # ([fv | xyz] @ W1 + b1)^T with fv = g*w_e + ws*b_e folded in,
        # expressed as column(32,1) x row(1,T) outer products:
        z = col(a) * g + col(bg) * ws + col(b)
        z = z + col(w) * x0 + col(w + 1) * x1 + col(w + 2) * x2
        return z                             # (32, T)

    # ---------------- stage one ----------------
    h = jnp.maximum(first_layer(0, 1, 2, 3), 0.0)
    h = jnp.maximum(dot(W2t, h) + col(6), 0.0)      # Linear(32,32)
    h = jnp.maximum(dot(W3t, h) + col(7), 0.0)      # Linear(32,32)
    h = jnp.maximum(dot(W4t, h) + col(8), 0.0)      # Linear(32,16) padded;
                                                    # rows 16.. stay exactly 0
    # ---------------- stage two on (x + h); x never materialized ----------
    t = first_layer(9, 10, 11, 12) + dot(V1t, h)    # x@v1 + h@v1 + c1
    t = jnp.maximum(t, 0.0)
    t = jnp.maximum(dot(V2t, t) + col(15), 0.0)     # Linear(32,32)
    t = jnp.maximum(dot(V3t, t) + col(16), 0.0)     # Linear(32,32)

    # Final Linear(32,1)+ReLU as a (1,32)@(32,T) row-matmul -> lane-dense store.
    out = dot(V4row[0:1, :], t)                     # (1, T)
    o_ref[...] = jnp.maximum(out + C[0:1, 18:19], 0.0)


def _grid_plan(nk):
    # Largest tile that still yields >= 4 grid steps (so v7x's two TensorCores
    # each see >= 2 steps of DMA/compute overlap); 128-point minimum tile.
    tile = 128
    for t in (1024, 512, 256, 128):
        if nk >= 4 * t:
            tile = t
            break
    grid_m = -(-nk // tile)
    # Even up SMALL odd grids so the two v7x TensorCores stay balanced; the
    # extra all-zero step costs ~0.35us + one tile of compute, negligible here.
    if 1 < grid_m < 8 and grid_m % 2 == 1:
        grid_m += 1
    return tile, grid_m


def decoder_pallas(pts, wpack, nk, tile, grid_m):
    nk_pad = grid_m * tile
    out2d = pl.pallas_call(
        _decoder_kernel,
        out_shape=jax.ShapeDtypeStruct((1, nk_pad), jnp.float32),
        grid=(grid_m,),
        in_specs=[
            pl.BlockSpec((_N_PT_ROWS, tile), lambda i: (0, i)),        # streamed
            pl.BlockSpec((_N_SLOTS, WIDTH, WIDTH), lambda i: (0, 0, 0)),  # resident
        ],
        out_specs=pl.BlockSpec((1, tile), lambda i: (0, i)),           # lane-dense
        compiler_params=pltpu.CompilerParams(
            dimension_semantics=("parallel",),
            vmem_limit_bytes=32 * 1024 * 1024),
    )(pts, wpack)
    return out2d.reshape(nk_pad)[:nk]        # (nk,), original point order


# --------------------------------------------------------------------------
# Host-side weight packing (encoder affine folded through grid_sample,
# all matrices pre-transposed for the (32, T) in-kernel layout).
# --------------------------------------------------------------------------
def _pack_decoder(params):
    w_e, b_e = params["w_e"], params["b_e"]          # (1, F) each
    (w1, b1, w2, b2, w3, b3, w4, b4,
     v1, c1, v2, c2, v3, c3, v4, c4) = params["decoder"]
    f = FEATURE_DIM

    def colv(r):                                     # row/vector -> (32,1) column
        c = jnp.asarray(r, jnp.float32).reshape(-1, 1)
        return jnp.pad(c, ((0, WIDTH - c.shape[0]), (0, 0)))

    zero_col = jnp.zeros((WIDTH, 1), jnp.float32)
    cols = [
        colv(w_e @ w1[:f]), colv(b_e @ w1[:f]), colv(b1),
        colv(w1[f]), colv(w1[f + 1]), colv(w1[f + 2]),
        colv(b2), colv(b3), colv(b4),
        colv(w_e @ v1[:f]), colv(b_e @ v1[:f]), colv(c1),
        colv(v1[f]), colv(v1[f + 1]), colv(v1[f + 2]),
        colv(c2), colv(c3),
        zero_col,                                    # unused slot 17
        colv(c4),                                    # c4 at row 0 of column 18
    ]
    cols += [zero_col] * (WIDTH - len(cols))
    C = jnp.concatenate(cols, axis=1)                # (32, 32)

    def mat32(m):                                    # zero-pad to (32, 32)
        return jnp.pad(m, ((0, WIDTH - m.shape[0]), (0, WIDTH - m.shape[1])))

    v4_row = jnp.pad(v4.T, ((0, WIDTH - 1), (0, 0)))  # (32,32), row 0 = v4^T

    wpack = jnp.stack(
        [C, w2.T, w3.T, mat32(w4.T), mat32(v1.T), v2.T, v3.T, v4_row],
        axis=0)                                       # (8, 32, 32)
    return wpack


# --------------------------------------------------------------------------
# JAX glue: trilinear grid_sample on the 1-channel LR image (+ weight sum).
# PyTorch semantics: coords = xyz_hr.flip(-1), mode='bilinear',
# align_corners=False, padding_mode='zeros'.  For input (N,1,S0,S1,S2):
#   xyz[...,0] indexes S0 (D), xyz[...,1] indexes S1 (H), xyz[...,2] indexes S2 (W).
# --------------------------------------------------------------------------
def trilinear_gather_1ch(img, xyz_hr):
    n, s0, s1, s2 = img.shape
    def unnorm(c, size):                              # align_corners=False
        return ((c + 1.0) * size - 1.0) / 2.0
    i0 = unnorm(xyz_hr[..., 0], s0)
    i1 = unnorm(xyz_hr[..., 1], s1)
    i2 = unnorm(xyz_hr[..., 2], s2)
    f0, f1, f2 = jnp.floor(i0), jnp.floor(i1), jnp.floor(i2)
    wz, wy, wx = i0 - f0, i1 - f1, i2 - f2

    flat = img.reshape(n, s0 * s1 * s2)
    gathered = jnp.zeros(xyz_hr.shape[:2], jnp.float32)
    wsum = jnp.zeros(xyz_hr.shape[:2], jnp.float32)
    for d0 in (0, 1):
        for d1 in (0, 1):
            for d2 in (0, 1):
                z, y, x = f0 + d0, f1 + d1, f2 + d2
                wgt = ((wz if d0 else 1.0 - wz)
                       * (wy if d1 else 1.0 - wy)
                       * (wx if d2 else 1.0 - wx))
                valid = ((z >= 0) & (z < s0) & (y >= 0) & (y < s1)
                         & (x >= 0) & (x < s2))
                zc = jnp.clip(z, 0, s0 - 1).astype(jnp.int32)
                yc = jnp.clip(y, 0, s1 - 1).astype(jnp.int32)
                xc = jnp.clip(x, 0, s2 - 1).astype(jnp.int32)
                idx = (zc * s1 + yc) * s2 + xc                    # (N, K)
                vals = jnp.take_along_axis(flat, idx, axis=1)     # (N, K)
                w_eff = wgt * valid.astype(jnp.float32)
                gathered = gathered + w_eff * vals
                wsum = wsum + w_eff
    return gathered, wsum


# --------------------------------------------------------------------------
# Parameter init (deterministic, PyTorch-Linear-style uniform bounds)
# --------------------------------------------------------------------------
def init_params(key):
    def linear(k, fan_in, fan_out):
        k1, k2 = jax.random.split(k)
        bound = 1.0 / (fan_in ** 0.5)
        w = jax.random.uniform(k1, (fan_in, fan_out), jnp.float32, -bound, bound)
        b = jax.random.uniform(k2, (1, fan_out), jnp.float32, -bound, bound)
        return w, b

    keys = jax.random.split(key, 9)
    w_e, b_e = linear(keys[0], 1, FEATURE_DIM)        # synthetic pointwise encoder

    dims = [
        (IN_DIM, WIDTH), (WIDTH, WIDTH), (WIDTH, WIDTH), (WIDTH, IN_DIM),   # stage_one
        (IN_DIM, WIDTH), (WIDTH, WIDTH), (WIDTH, WIDTH), (WIDTH, OUT_DIM),  # stage_two
    ]
    dec = []
    for i, (fi, fo) in enumerate(dims):
        w, b = linear(keys[1 + i], fi, fo)
        dec.extend([w, b])
    return {"w_e": w_e, "b_e": b_e, "decoder": tuple(dec)}


def _cube_side(k):
    r = int(round(k ** (1.0 / 3.0)))
    for c in (r - 1, r, r + 1):
        if c > 0 and c * c * c == k:
            return c
    return r   # non-cube K: final reshape raises, mirroring the PyTorch reference


# --------------------------------------------------------------------------
# ArSSR forward
# --------------------------------------------------------------------------
def arssr_forward(img_lr, xyz_hr, params):
    # img_lr: (N, 1, S0, S1, S2)   xyz_hr: (N, K, 3)
    n = img_lr.shape[0]
    k = xyz_hr.shape[1]
    nk = n * k

    img = img_lr[:, 0].astype(jnp.float32)            # (N, S0, S1, S2)
    xyz = xyz_hr.astype(jnp.float32)
    gathered, wsum = trilinear_gather_1ch(img, xyz)   # (N, K) each

    tile, grid_m = _grid_plan(nk)
    nk_pad = grid_m * tile

    # Lane-dense point-stream pack: rows [x0, x1, x2, g, ws, 0, 0, 0].
    pts = jnp.concatenate([
        xyz.reshape(nk, 3).T,                         # (3, NK)
        gathered.reshape(1, nk),
        wsum.reshape(1, nk),
        jnp.zeros((_N_PT_ROWS - 5, nk), jnp.float32),
    ], axis=0)                                        # (8, NK)
    if nk_pad != nk:
        pts = jnp.pad(pts, ((0, 0), (0, nk_pad - nk)))

    wpack = _pack_decoder(params)
    out = decoder_pallas(pts, wpack, nk, tile, grid_m)   # (N*K,)

    hh = _cube_side(k)
    return out.reshape(n, 1, hh, hh, hh)


if __name__ == "__main__":
    key = jax.random.PRNGKey(0)
    k_param, k_img, k_xyz = jax.random.split(key, 3)

    N = 2
    S0, S1, S2 = 6, 8, 10            # anisotropic LR volume (exercises axis mapping)
    K = 8 ** 3                       # HR coordinate samples (perfect cube)

    params = init_params(k_param)
    img_lr = jax.random.normal(k_img, (N, 1, S0, S1, S2), jnp.float32)
    xyz_hr = jax.random.uniform(k_xyz, (N, K, 3), jnp.float32, -1.0, 1.0)

    img_sr = jax.jit(arssr_forward)(img_lr, xyz_hr, params)
    img_sr = jax.block_until_ready(img_sr)

    assert img_sr.shape == (N, 1, 8, 8, 8), img_sr.shape
    assert img_sr.dtype == jnp.float32
    assert bool(jnp.all(jnp.isfinite(img_sr)))
    print("KERNEL_OK")
</pallas_src>

<mosaic_0001>
module attributes {stable_mosaic.version = 11 : i64} {
  func.func @_decoder_kernel(%arg0: i32, %arg1: memref<8x256xf32, #tpu.memory_space<vmem>>, %arg2: memref<8x32x32xf32, #tpu.memory_space<vmem>>, %arg3: memref<1x256xf32, #tpu.memory_space<vmem>>) attributes {dimension_semantics = [#tpu.dimension_semantics<parallel>], iteration_bounds = array<i64: 4>, scalar_prefetch = 0 : i64, scratch_operands = 0 : i64, tpu.core_type = #tpu.core_type<tc>, window_params = [{transform_indices = @transform_0, window_bounds = array<i64: 8, 256>}, {pipeline_mode = #tpu.pipeline_mode<synchronous>, transform_indices = @transform_1, window_bounds = array<i64: 8, 32, 32>}, {transform_indices = @transform_2, window_bounds = array<i64: 1, 256>}]} {
    %c0 = arith.constant 0 : index
    %c0_0 = arith.constant 0 : index
    %0 = vector.load %arg1[%c0, %c0_0] : memref<8x256xf32, #tpu.memory_space<vmem>>, vector<8x256xf32>
    %1 = vector.extract_strided_slice %0 {offsets = [0, 0], sizes = [1, 256], strides = [1, 1]} : vector<8x256xf32> to vector<1x256xf32>
    %2 = vector.extract_strided_slice %0 {offsets = [1, 0], sizes = [1, 256], strides = [1, 1]} : vector<8x256xf32> to vector<1x256xf32>
    %3 = vector.extract_strided_slice %0 {offsets = [2, 0], sizes = [1, 256], strides = [1, 1]} : vector<8x256xf32> to vector<1x256xf32>
    %4 = vector.extract_strided_slice %0 {offsets = [3, 0], sizes = [1, 256], strides = [1, 1]} : vector<8x256xf32> to vector<1x256xf32>
    %5 = vector.extract_strided_slice %0 {offsets = [4, 0], sizes = [1, 256], strides = [1, 1]} : vector<8x256xf32> to vector<1x256xf32>
    %c0_1 = arith.constant 0 : index
    %c0_2 = arith.constant 0 : index
    %c0_3 = arith.constant 0 : index
    %6 = vector.load %arg2[%c0_1, %c0_2, %c0_3] : memref<8x32x32xf32, #tpu.memory_space<vmem>>, vector<1x32x32xf32>
    %7 = vector.shape_cast %6 : vector<1x32x32xf32> to vector<32x32xf32>
    %c1 = arith.constant 1 : index
    %c0_4 = arith.constant 0 : index
    %c0_5 = arith.constant 0 : index
    %8 = vector.load %arg2[%c1, %c0_4, %c0_5] : memref<8x32x32xf32, #tpu.memory_space<vmem>>, vector<1x32x32xf32>
    %9 = vector.shape_cast %8 : vector<1x32x32xf32> to vector<32x32xf32>
    %c2 = arith.constant 2 : index
    %c0_6 = arith.constant 0 : index
    %c0_7 = arith.constant 0 : index
    %10 = vector.load %arg2[%c2, %c0_6, %c0_7] : memref<8x32x32xf32, #tpu.memory_space<vmem>>, vector<1x32x32xf32>
    %11 = vector.shape_cast %10 : vector<1x32x32xf32> to vector<32x32xf32>
    %c3 = arith.constant 3 : index
    %c0_8 = arith.constant 0 : index
    %c0_9 = arith.constant 0 : index
    %12 = vector.load %arg2[%c3, %c0_8, %c0_9] : memref<8x32x32xf32, #tpu.memory_space<vmem>>, vector<1x32x32xf32>
    %13 = vector.shape_cast %12 : vector<1x32x32xf32> to vector<32x32xf32>
    %c4 = arith.constant 4 : index
    %c0_10 = arith.constant 0 : index
    %c0_11 = arith.constant 0 : index
    %14 = vector.load %arg2[%c4, %c0_10, %c0_11] : memref<8x32x32xf32, #tpu.memory_space<vmem>>, vector<1x32x32xf32>
    %15 = vector.shape_cast %14 : vector<1x32x32xf32> to vector<32x32xf32>
    %c5 = arith.constant 5 : index
    %c0_12 = arith.constant 0 : index
    %c0_13 = arith.constant 0 : index
    %16 = vector.load %arg2[%c5, %c0_12, %c0_13] : memref<8x32x32xf32, #tpu.memory_space<vmem>>, vector<1x32x32xf32>
    %17 = vector.shape_cast %16 : vector<1x32x32xf32> to vector<32x32xf32>
    %c6 = arith.constant 6 : index
    %c0_14 = arith.constant 0 : index
    %c0_15 = arith.constant 0 : index
    %18 = vector.load %arg2[%c6, %c0_14, %c0_15] : memref<8x32x32xf32, #tpu.memory_space<vmem>>, vector<1x32x32xf32>
    %19 = vector.shape_cast %18 : vector<1x32x32xf32> to vector<32x32xf32>
    %c7 = arith.constant 7 : index
    %c0_16 = arith.constant 0 : index
    %c0_17 = arith.constant 0 : index
    %20 = vector.load %arg2[%c7, %c0_16, %c0_17] : memref<8x32x32xf32, #tpu.memory_space<vmem>>, vector<1x32x32xf32>
    %21 = vector.shape_cast %20 : vector<1x32x32xf32> to vector<32x32xf32>
    %22 = vector.extract_strided_slice %7 {offsets = [0, 0], sizes = [32, 1], strides = [1, 1]} : vector<32x32xf32> to vector<32x1xf32>
    %23 = vector.broadcast %22 : vector<32x1xf32> to vector<32x256xf32>
    %24 = vector.broadcast %4 : vector<1x256xf32> to vector<32x256xf32>
    %25 = arith.mulf %23, %24 : vector<32x256xf32>
    %26 = vector.extract_strided_slice %7 {offsets = [0, 1], sizes = [32, 1], strides = [1, 1]} : vector<32x32xf32> to vector<32x1xf32>
    %27 = vector.broadcast %26 : vector<32x1xf32> to vector<32x256xf32>
    %28 = vector.broadcast %5 : vector<1x256xf32> to vector<32x256xf32>
    %29 = arith.mulf %27, %28 : vector<32x256xf32>
    %30 = arith.addf %25, %29 : vector<32x256xf32>
    %31 = vector.extract_strided_slice %7 {offsets = [0, 2], sizes = [32, 1], strides = [1, 1]} : vector<32x32xf32> to vector<32x1xf32>
    %32 = vector.broadcast %31 : vector<32x1xf32> to vector<32x256xf32>
    %33 = arith.addf %30, %32 : vector<32x256xf32>
    %34 = vector.extract_strided_slice %7 {offsets = [0, 3], sizes = [32, 1], strides = [1, 1]} : vector<32x32xf32> to vector<32x1xf32>
    %35 = vector.broadcast %34 : vector<32x1xf32> to vector<32x256xf32>
    %36 = vector.broadcast %1 : vector<1x256xf32> to vector<32x256xf32>
    %37 = arith.mulf %35, %36 : vector<32x256xf32>
    %38 = arith.addf %33, %37 : vector<32x256xf32>
    %39 = vector.extract_strided_slice %7 {offsets = [0, 4], sizes = [32, 1], strides = [1, 1]} : vector<32x32xf32> to vector<32x1xf32>
    %40 = vector.broadcast %39 : vector<32x1xf32> to vector<32x256xf32>
    %41 = vector.broadcast %2 : vector<1x256xf32> to vector<32x256xf32>
    %42 = arith.mulf %40, %41 : vector<32x256xf32>
    %43 = arith.addf %38, %42 : vector<32x256xf32>
    %44 = vector.extract_strided_slice %7 {offsets = [0, 5], sizes = [32, 1], strides = [1, 1]} : vector<32x32xf32> to vector<32x1xf32>
    %45 = vector.broadcast %44 : vector<32x1xf32> to vector<32x256xf32>
    %46 = vector.broadcast %3 : vector<1x256xf32> to vector<32x256xf32>
    %47 = arith.mulf %45, %46 : vector<32x256xf32>
    %48 = arith.addf %43, %47 : vector<32x256xf32>
    %cst = arith.constant 0.000000e+00 : f32
    %49 = vector.broadcast %cst : f32 to vector<32x256xf32>
    %50 = arith.maximumf %48, %49 : vector<32x256xf32>
    %cst_18 = arith.constant dense<0.000000e+00> : vector<32x256xf32>
    %51 = tpu.matmul %9, %50, %cst_18 {dimension_numbers = #tpu.dot_dimension_numbers<[1], [0], [0], [1], [0, 0, 1, 1], [], []>} : vector<32x32xf32>, vector<32x256xf32>, vector<32x256xf32> -> vector<32x256xf32>
    %52 = vector.extract_strided_slice %7 {offsets = [0, 6], sizes = [32, 1], strides = [1, 1]} : vector<32x32xf32> to vector<32x1xf32>
    %53 = vector.broadcast %52 : vector<32x1xf32> to vector<32x256xf32>
    %54 = arith.addf %51, %53 : vector<32x256xf32>
    %cst_19 = arith.constant 0.000000e+00 : f32
    %55 = vector.broadcast %cst_19 : f32 to vector<32x256xf32>
    %56 = arith.maximumf %54, %55 : vector<32x256xf32>
    %cst_20 = arith.constant dense<0.000000e+00> : vector<32x256xf32>
    %57 = tpu.matmul %11, %56, %cst_20 {dimension_numbers = #tpu.dot_dimension_numbers<[1], [0], [0], [1], [0, 0, 1, 1], [], []>} : vector<32x32xf32>, vector<32x256xf32>, vector<32x256xf32> -> vector<32x256xf32>
    %58 = vector.extract_strided_slice %7 {offsets = [0, 7], sizes = [32, 1], strides = [1, 1]} : vector<32x32xf32> to vector<32x1xf32>
    %59 = vector.broadcast %58 : vector<32x1xf32> to vector<32x256xf32>
    %60 = arith.addf %57, %59 : vector<32x256xf32>
    %cst_21 = arith.constant 0.000000e+00 : f32
    %61 = vector.broadcast %cst_21 : f32 to vector<32x256xf32>
    %62 = arith.maximumf %60, %61 : vector<32x256xf32>
    %cst_22 = arith.constant dense<0.000000e+00> : vector<32x256xf32>
    %63 = tpu.matmul %13, %62, %cst_22 {dimension_numbers = #tpu.dot_dimension_numbers<[1], [0], [0], [1], [0, 0, 1, 1], [], []>} : vector<32x32xf32>, vector<32x256xf32>, vector<32x256xf32> -> vector<32x256xf32>
    %64 = vector.extract_strided_slice %7 {offsets = [0, 8], sizes = [32, 1], strides = [1, 1]} : vector<32x32xf32> to vector<32x1xf32>
    %65 = vector.broadcast %64 : vector<32x1xf32> to vector<32x256xf32>
    %66 = arith.addf %63, %65 : vector<32x256xf32>
    %cst_23 = arith.constant 0.000000e+00 : f32
    %67 = vector.broadcast %cst_23 : f32 to vector<32x256xf32>
    %68 = arith.maximumf %66, %67 : vector<32x256xf32>
    %69 = vector.extract_strided_slice %7 {offsets = [0, 9], sizes = [32, 1], strides = [1, 1]} : vector<32x32xf32> to vector<32x1xf32>
    %70 = vector.broadcast %69 : vector<32x1xf32> to vector<32x256xf32>
    %71 = vector.broadcast %4 : vector<1x256xf32> to vector<32x256xf32>
    %72 = arith.mulf %70, %71 : vector<32x256xf32>
    %73 = vector.extract_strided_slice %7 {offsets = [0, 10], sizes = [32, 1], strides = [1, 1]} : vector<32x32xf32> to vector<32x1xf32>
    %74 = vector.broadcast %73 : vector<32x1xf32> to vector<32x256xf32>
    %75 = vector.broadcast %5 : vector<1x256xf32> to vector<32x256xf32>
    %76 = arith.mulf %74, %75 : vector<32x256xf32>
    %77 = arith.addf %72, %76 : vector<32x256xf32>
    %78 = vector.extract_strided_slice %7 {offsets = [0, 11], sizes = [32, 1], strides = [1, 1]} : vector<32x32xf32> to vector<32x1xf32>
    %79 = vector.broadcast %78 : vector<32x1xf32> to vector<32x256xf32>
    %80 = arith.addf %77, %79 : vector<32x256xf32>
    %81 = vector.extract_strided_slice %7 {offsets = [0, 12], sizes = [32, 1], strides = [1, 1]} : vector<32x32xf32> to vector<32x1xf32>
    %82 = vector.broadcast %81 : vector<32x1xf32> to vector<32x256xf32>
    %83 = vector.broadcast %1 : vector<1x256xf32> to vector<32x256xf32>
    %84 = arith.mulf %82, %83 : vector<32x256xf32>
    %85 = arith.addf %80, %84 : vector<32x256xf32>
    %86 = vector.extract_strided_slice %7 {offsets = [0, 13], sizes = [32, 1], strides = [1, 1]} : vector<32x32xf32> to vector<32x1xf32>
    %87 = vector.broadcast %86 : vector<32x1xf32> to vector<32x256xf32>
    %88 = vector.broadcast %2 : vector<1x256xf32> to vector<32x256xf32>
    %89 = arith.mulf %87, %88 : vector<32x256xf32>
    %90 = arith.addf %85, %89 : vector<32x256xf32>
    %91 = vector.extract_strided_slice %7 {offsets = [0, 14], sizes = [32, 1], strides = [1, 1]} : vector<32x32xf32> to vector<32x1xf32>
    %92 = vector.broadcast %91 : vector<32x1xf32> to vector<32x256xf32>
    %93 = vector.broadcast %3 : vector<1x256xf32> to vector<32x256xf32>
    %94 = arith.mulf %92, %93 : vector<32x256xf32>
    %95 = arith.addf %90, %94 : vector<32x256xf32>
    %cst_24 = arith.constant dense<0.000000e+00> : vector<32x256xf32>
    %96 = tpu.matmul %15, %68, %cst_24 {dimension_numbers = #tpu.dot_dimension_numbers<[1], [0], [0], [1], [0, 0, 1, 1], [], []>} : vector<32x32xf32>, vector<32x256xf32>, vector<32x256xf32> -> vector<32x256xf32>
    %97 = arith.addf %95, %96 : vector<32x256xf32>
    %cst_25 = arith.constant 0.000000e+00 : f32
    %98 = vector.broadcast %cst_25 : f32 to vector<32x256xf32>
    %99 = arith.maximumf %97, %98 : vector<32x256xf32>
    %cst_26 = arith.constant dense<0.000000e+00> : vector<32x256xf32>
    %100 = tpu.matmul %17, %99, %cst_26 {dimension_numbers = #tpu.dot_dimension_numbers<[1], [0], [0], [1], [0, 0, 1, 1], [], []>} : vector<32x32xf32>, vector<32x256xf32>, vector<32x256xf32> -> vector<32x256xf32>
    %101 = vector.extract_strided_slice %7 {offsets = [0, 15], sizes = [32, 1], strides = [1, 1]} : vector<32x32xf32> to vector<32x1xf32>
    %102 = vector.broadcast %101 : vector<32x1xf32> to vector<32x256xf32>
    %103 = arith.addf %100, %102 : vector<32x256xf32>
    %cst_27 = arith.constant 0.000000e+00 : f32
    %104 = vector.broadcast %cst_27 : f32 to vector<32x256xf32>
    %105 = arith.maximumf %103, %104 : vector<32x256xf32>
    %cst_28 = arith.constant dense<0.000000e+00> : vector<32x256xf32>
    %106 = tpu.matmul %19, %105, %cst_28 {dimension_numbers = #tpu.dot_dimension_numbers<[1], [0], [0], [1], [0, 0, 1, 1], [], []>} : vector<32x32xf32>, vector<32x256xf32>, vector<32x256xf32> -> vector<32x256xf32>
    %107 = vector.extract_strided_slice %7 {offsets = [0, 16], sizes = [32, 1], strides = [1, 1]} : vector<32x32xf32> to vector<32x1xf32>
    %108 = vector.broadcast %107 : vector<32x1xf32> to vector<32x256xf32>
    %109 = arith.addf %106, %108 : vector<32x256xf32>
    %cst_29 = arith.constant 0.000000e+00 : f32
    %110 = vector.broadcast %cst_29 : f32 to vector<32x256xf32>
    %111 = arith.maximumf %109, %110 : vector<32x256xf32>
    %112 = vector.extract_strided_slice %21 {offsets = [0, 0], sizes = [1, 32], strides = [1, 1]} : vector<32x32xf32> to vector<1x32xf32>
    %cst_30 = arith.constant dense<0.000000e+00> : vector<1x256xf32>
    %113 = tpu.matmul %112, %111, %cst_30 {dimension_numbers = #tpu.dot_dimension_numbers<[1], [0], [0], [1], [0, 0, 1, 1], [], []>} : vector<1x32xf32>, vector<32x256xf32>, vector<1x256xf32> -> vector<1x256xf32>
    %114 = vector.extract_strided_slice %7 {offsets = [0, 18], sizes = [1, 1], strides = [1, 1]} : vector<32x32xf32> to vector<1x1xf32>
    %115 = vector.broadcast %114 : vector<1x1xf32> to vector<1x256xf32>
    %116 = arith.addf %113, %115 : vector<1x256xf32>
    %cst_31 = arith.constant 0.000000e+00 : f32
    %117 = vector.broadcast %cst_31 : f32 to vector<1x256xf32>
    %118 = arith.maximumf %116, %117 : vector<1x256xf32>
    %c0_32 = arith.constant 0 : index
    %c0_33 = arith.constant 0 : index
    %119 = vector.load %arg3[%c0_32, %c0_33] : memref<1x256xf32, #tpu.memory_space<vmem>>, vector<1x256xf32>
    tpu.vector_store %arg3[%c0_32, %c0_33], %118 {strides = array<i32>} : memref<1x256xf32, #tpu.memory_space<vmem>>, vector<1x256xf32>,
    return
  }
  func.func @transform_0(%arg0: i32) -> (i32, i32) {
    %c0_i32 = arith.constant 0 : i32
    %c0_i32_0 = arith.constant 0 : i32
    return %c0_i32, %arg0 : i32, i32
  }
  func.func @transform_1(%arg0: i32) -> (i32, i32, i32) {
    %c0_i32 = arith.constant 0 : i32
    %c0_i32_0 = arith.constant 0 : i32
    %c0_i32_1 = arith.constant 0 : i32
    %c0_i32_2 = arith.constant 0 : i32
    return %c0_i32, %c0_i32_0, %c0_i32_1 : i32, i32, i32
  }
  func.func @transform_2(%arg0: i32) -> (i32, i32) {
    %c0_i32 = arith.constant 0 : i32
    %c0_i32_0 = arith.constant 0 : i32
    return %c0_i32, %arg0 : i32, i32
  }
}

</mosaic_0001>

<bundles_post_ra>
// kernel: squeeze.13
= control target key start
LH: loop header
LB: loop body
LE: loop exit
PB: predicated region body
PF: predicated region fallthrough
CT: control target
= control target key end

     0   :  { %2 = vsyncpa [#allocation1], 0  ;;  %s505_s6 = smov [#allocation0]   ;;  %s591_s0 = inlined_call_operand.hbm [shape: f32[2,1,6,8,10], index: 0, kind: input, shape index: {}]   ;;  %s592_s1 = inlined_call_operand.vmem [shape: f32[2,480], index: 1, kind: output, shape index: {}]  }
   0x1   :  { %s7_s7 = sshll.u32 %s505_s6, 4  ;;  %s481_s10 = scalar_lea.hbm %s591_s0, 1536  ;;  %s8_s7 = int_to_ptr.vmem [resolvable:$true] %s7_s7 }
   0x2   :  { %p482_p0 = scmp.ne.s32.totalorder %s591_s0, %s481_s10  ;;  %p485_p1 = scmp.lt.u32.totalorder %s481_s10, %s591_s0 }
   0x4   :  { %p487_p2 = pnand %p485_p1, %p482_p0 }
   0x6   :  { %490 = shalt.err (!%p487_p2)
}
   0x7   :  { %s491_s15 = scalar_lea.vmem %s8_s7, 1536  ;;  %p496_p4 = scmp.lt.s32.totalorder %s8_s7, %s8_s7 }
   0x8   :  { %p492_p3 = scmp.ne.s32.totalorder %s8_s7, %s491_s15  ;;  %p497_p5 = scmp.lt.s32.totalorder %s491_s15, %s491_s15 }
   0xa   :  { %p498_p6 = por %p497_p5, %p496_p4 }
   0xc   :  { %p499_p7 = pnand %p498_p6, %p492_p3 }
   0xe   :  { %502 = shalt.err (!%p499_p7)
}
   0xf   :  { %10 = dma.hbm_to_vmem [thread:$0]  %s591_s0, 1536, %s8_s7, [#allocation1]  }
  0x10   :  { %503 = dma.done.wait [#allocation1], 1536  }
  0x11   :  { %504 = vsyncadd [#allocation1], 4294965760  ;;  %s72_s0 = smov 3  ;;  %s64_s18 = smov 3  ;;  %vm22_vm0 = vcmask 31744   ;;  %vm54_vm1 = vcmask 64512  }
  0x12   :  { %s80_s19 = smov 3  ;;  %s17_s20 = smov 3  ;;  %v73_v0 = vld [vmem:[#allocation0 + $0x18] ss:$48 sm:%s72_s0]   ;;  %v65_v1 = vld [vmem:[#allocation0 + $0x25] ss:$48 sm:%s64_s18]  }
  0x13   :  { %s20_s21 = smov 3  ;;  %s49_s22 = smov 3  ;;  %v18_v2 = vld [vmem:[#allocation0 + $0x26] ss:$48 sm:%s17_s20]   ;;  %vm26_vm2 = vcmask 48128   ;;  %vm14_vm3 = vcmask 80896  }
  0x14   :  { %s52_s23 = smov 3  ;;  %s33_s24 = smov 3  ;;  %v21_v3 = vld [vmem:[#allocation0 + $0x26] ss:$48 sm:%s20_s21]   ;;  %v81_v4 = vld [vmem:[#allocation0 + $0xb] ss:$48 sm:%s80_s19]  }
  0x15   :  { %s36_s25 = smov 3  ;;  %s506_s26 = smov 112   ;;  %v23_v5 = vsel %vm22_vm0, %v21_v3, %v18_v2  ;;  %v50_v6 = vld [vmem:[#allocation0 + $0xc] ss:$48 sm:%s49_s22]   ;;  %v34_v8 = vld [vmem:[#allocation0 + $0x19] ss:$48 sm:%s33_s24]  }
  0x16   :  { %74 = vrot.lane.b32.xlu0 %v73_v0, %s506_s26  ;;  %s507_s27 = smov 114   ;;  %v53_v7 = vld [vmem:[#allocation0 + $0xc] ss:$48 sm:%s52_s23]   ;;  %v37_v9 = vld [vmem:[#allocation0 + $0x19] ss:$48 sm:%s36_s25]   ;;  %s508_s28 = smov 110  }
  0x17   :  { %66 = vrot.lane.b32.xlu1 %v65_v1, %s507_s27  ;;  %s509_s29 = smov 124   ;;  %v55_v10 = vsel %vm54_vm1, %v53_v7, %v50_v6  ;;  %v39_v11 = vsel %vm26_vm2, %v37_v9, %v34_v8  ;;  %s87_s30 = smov 3  ;;  %vm29_vm4 = vcmask 1048544   ;;  %vm61_vm5 = vcmask 1048512  }
  0x18   :  { %s95_s2 = smov 3  ;;  %s510_s3 = smov 120   ;;  %v88_v12 = vld [vmem:[#allocation0 + $0x24] ss:$48 sm:%s87_s30]   ;;  %vm45_vm6 = vcmask 1048528   ;;  %vm68_vm7 = vcmask 1015696  }
  0x19   :  { %s511_s4 = smov 122   ;;  %v96_v13 = vld [vmem:[#allocation0 + $0x17] ss:$48 sm:%s95_s2]   ;;  %s103_s5 = smov 3  ;;  %vm84_vm8 = vcmask 982896   ;;  %vm58_vm9 = vcmask 15360  }
  0x1a   :  { %24 = vrot.lane.b32.xlu0 %v23_v5, %s509_s29  ;;  %s110_s6 = smov 3  ;;  %s512_s7 = smov 104   ;;  %v104_v14 = vld [vmem:[#allocation0 + $0xa] ss:$48 sm:%s103_s5]   ;;  %vm76_vm10 = vcmask 999296   ;;  %vm91_vm11 = vcmask 933696  }
  0x1b   :  { %82 = vrot.lane.b32.xlu1 %v81_v4, %s508_s28  ;;  %s513_s8 = smov 102   ;;  %v111_v15 = vld [vmem:[#allocation0 + $0x23] ss:$48 sm:%s110_s6]   ;;  %s118_s9 = smov 3  ;;  %vm99_vm12 = vcmask 917296   ;;  %vm107_vm13 = vcmask 900896  }
  0x1c   :  { %s126_s10 = smov 3  ;;  %s514_s11 = smov 100   ;;  %v119_v16 = vld [vmem:[#allocation0 + $0x16] ss:$48 sm:%s118_s9]   ;;  %vm114_vm14 = vcmask 851696   ;;  %vm122_vm15 = vcmask 835296  }
  0x1d   :  { %s515_s12 = smov 94   ;;  %v127_v17 = vld [vmem:[#allocation0 + $0x9] ss:$48 sm:%s126_s10]   ;;  %s133_s13 = smov 3  ;;  %vm137_vm1 = vcmask 786096  }
  0x1e   :  { %40 = vrot.lane.b32.xlu0 %v39_v11, %s511_s4  ;;  %s141_s14 = smov 3  ;;  %s516_s15 = smov 92   ;;  %v134_v18 = vld [vmem:[#allocation0 + $0x2f] ss:$48 sm:%s133_s13]  }
  0x1f   :  { %56 = vrot.lane.b32.xlu1 %v55_v10, %s510_s3  ;;  %s517_s16 = smov 90   ;;  %v142_v19 = vld [vmem:[#allocation0 + $0x22] ss:$48 sm:%s141_s14]   ;;  %s149_s17 = smov 3 }
  0x20   :  { %s157_s0 = smov 3  ;;  %s518_s18 = smov 86   ;;  %v150_v20 = vld [vmem:[#allocation0 + $0x15] ss:$48 sm:%s149_s17]  }
  0x21   :  { %s519_s19 = smov 84   ;;  %v158_v21 = vld [vmem:[#allocation0 + $0x8] ss:$48 sm:%s157_s0]   ;;  %s164_s20 = smov 3 }
  0x22   :  { %89 = vrot.lane.b32.xlu0 %v88_v12, %s512_s7  ;;  %s172_s21 = smov 3  ;;  %s520_s22 = smov 82   ;;  %v165_v22 = vld [vmem:[#allocation0 + $0x2e] ss:$48 sm:%s164_s20]  }
  0x23   :  { %97 = vrot.lane.b32.xlu1 %v96_v13, %s513_s8  ;;  %s521_s23 = smov 80   ;;  %v173_v23 = vld [vmem:[#allocation0 + $0x21] ss:$48 sm:%s172_s21]   ;;  %s180_s24 = smov 3 }
  0x24   :  { %s188_s25 = smov 3  ;;  %s522_s26 = smov 76   ;;  %v181_v24 = vld [vmem:[#allocation0 + $0x14] ss:$48 sm:%s180_s24]  }
  0x25   :  { %s523_s27 = smov 74   ;;  %v189_v25 = vld [vmem:[#allocation0 + $0x7] ss:$48 sm:%s188_s25]   ;;  %s195_s28 = smov 3 }
  0x26   :  { %105 = vrot.lane.b32.xlu0 %v104_v14, %s514_s11  ;;  %s203_s29 = smov 3  ;;  %s524_s30 = smov 72   ;;  %v196_v26 = vld [vmem:[#allocation0 + $0x2d] ss:$48 sm:%s195_s28]  }
  0x27   :  { %112 = vrot.lane.b32.xlu1 %v111_v15, %s515_s12  ;;  %s525_s2 = smov 70   ;;  %v204_v27 = vld [vmem:[#allocation0 + $0x20] ss:$48 sm:%s203_s29]   ;;  %s211_s3 = smov 3 }
  0x28   :  { %s219_s4 = smov 3  ;;  %s526_s5 = smov 66   ;;  %v212_v28 = vld [vmem:[#allocation0 + $0x13] ss:$48 sm:%s211_s3]  }
  0x29   :  { %s527_s6 = smov 64   ;;  %v220_v29 = vld [vmem:[#allocation0 + $0x6] ss:$48 sm:%s219_s4]   ;;  %s226_s7 = smov 3 }
  0x2a   :  { %120 = vrot.lane.b32.xlu0 %v119_v16, %s516_s15  ;;  %s234_s8 = smov 3  ;;  %s12_s9 = smov 3  ;;  %v227_v31 = vld [vmem:[#allocation0 + $0x2c] ss:$48 sm:%s226_s7]  }
  0x2b   :  { %128 = vrot.lane.b32.xlu1 %v127_v17, %s517_s16  ;;  %v13_v30 = vld [vmem:[#allocation0] ss:$48 sm:%s12_s9]   ;;  %s528_s10 = smov 62   ;;  %s529_s11 = smov 60   ;;  %v235_v32 = vld [vmem:[#allocation0 + $0x1f] ss:$48 sm:%s234_s8]  }
  0x2c   :  { %15 = vst.msk [vmem:[#allocation2] sm:$0x3] %vm14_vm3, %v13_v30   ;;  %s242_s12 = smov 3  ;;  %s250_s13 = smov 3  ;;  %vm153_vm3 = vcmask 753296  }
  0x2d   :  { %s530_s14 = smov 56   ;;  %s531_s15 = smov 54   ;;  %v243_v33 = vld [vmem:[#allocation0 + $0x12] ss:$48 sm:%s242_s12]   ;;  %v251_v34 = vld [vmem:[#allocation0 + $0x5] ss:$48 sm:%s250_s13]  }
  0x2e   :  { %135 = vrot.lane.b32.xlu0 %v134_v18, %s518_s18  ;;  %s257_s16 = smov 3  ;;  %s265_s17 = smov 3 }
  0x2f   :  { %143 = vrot.lane.b32.xlu1 %v142_v19, %s519_s19  ;;  %s532_s0 = smov 52   ;;  %s533_s18 = smov 50   ;;  %v258_v35 = vld [vmem:[#allocation0 + $0x2b] ss:$48 sm:%s257_s16]   ;;  %v266_v36 = vld [vmem:[#allocation0 + $0x1e] ss:$48 sm:%s265_s17]  }
  0x30   :  { %s273_s19 = smov 3  ;;  %s281_s20 = smov 3 }
  0x31   :  { %s534_s21 = smov 46   ;;  %v274_v37 = vld [vmem:[#allocation0 + $0x11] ss:$48 sm:%s273_s19]   ;;  %v282_v38 = vld [vmem:[#allocation0 + $0x4] ss:$48 sm:%s281_s20]   ;;  %s296_s24 = smov 3 }
  0x32   :  { %151 = vrot.lane.b32.xlu0 %v150_v20, %s520_s22  ;;  %s535_s22 = smov 44   ;;  %s536_s25 = smov 42   ;;  %v297_v40 = vld [vmem:[#allocation0 + $0x1d] ss:$48 sm:%s296_s24]  }
  0x33   :  { %159 = vrot.lane.b32.xlu1 %v158_v21, %s521_s23  ;;  %s288_s23 = smov 3  ;;  %s312_s28 = smov 3 }
  0x34   :  { %v289_v39 = vld [vmem:[#allocation0 + $0x2a] ss:$48 sm:%s288_s23]   ;;  %s538_s29 = smov 36   ;;  %v313_v42 = vld [vmem:[#allocation0 + $0x3] ss:$48 sm:%s312_s28]   ;;  %s327_s3 = smov 3 }
  0x35   :  { %s540_s4 = smov 32   ;;  %v328_v44 = vld [vmem:[#allocation0 + $0x1c] ss:$48 sm:%s327_s3]   ;;  %s343_s7 = smov 3 }
  0x36   :  { %166 = vrot.lane.b32.xlu0 %v165_v22, %s522_s26  ;;  %s537_s26 = smov 40   ;;  %s542_s8 = smov 26   ;;  %v344_v46 = vld [vmem:[#allocation0 + $0x2] ss:$48 sm:%s343_s7]  }
  0x37   :  { %174 = vrot.lane.b32.xlu1 %v173_v23, %s523_s27  ;;  %s304_s27 = smov 3  ;;  %s543_s9 = smov 24  }
  0x38   :  { %v305_v41 = vld [vmem:[#allocation0 + $0x10] ss:$48 sm:%s304_s27]   ;;  %s544_s12 = smov 22   ;;  %s545_s13 = smov 20  }
  0x39   :  { %s546_s16 = smov 16   ;;  %s547_s17 = smov 14  }
  0x3a   :  { %182 = vrot.lane.b32.xlu0 %v181_v24, %s524_s30  ;;  %s539_s30 = smov 34   ;;  %s548_s19 = smov 12  }
  0x3b   :  { %190 = vrot.lane.b32.xlu1 %v189_v25, %s525_s2  ;;  %s319_s2 = smov 3  ;;  %s549_s20 = smov 10  }
  0x3c   :  { %v320_v43 = vld [vmem:[#allocation0 + $0x29] ss:$48 sm:%s319_s2]   ;;  %s551_s23 = smov 4   ;;  %s552_s24 = smov 2  }
  0x3e   :  { %197 = vrot.lane.b32.xlu0 %v196_v26, %s526_s5  ;;  %s541_s5 = smov 30  }
  0x3f   :  { %205 = vrot.lane.b32.xlu1 %v204_v27, %s527_s6  ;;  %s335_s6 = smov 3 }
  0x40   :  { %v336_v45 = vld [vmem:[#allocation0 + $0xf] ss:$48 sm:%s335_s6]  }
  0x42   :  { %213 = vrot.lane.b32.xlu0 %v212_v28, %s528_s10  ;;  %s350_s10 = smov 3 }
  0x43   :  { %221 = vrot.lane.b32.xlu1 %v220_v29, %s529_s11  ;;  %s358_s11 = smov 3  ;;  %v351_v47 = vld [vmem:[#allocation0 + $0x28] ss:$48 sm:%s350_s10]  }
  0x44   :  { %v359_v48 = vld [vmem:[#allocation0 + $0x1b] ss:$48 sm:%s358_s11]  }
  0x46   :  { %228 = vrot.lane.b32.xlu0 %v227_v31, %s530_s14  ;;  %s366_s14 = smov 3 }
  0x47   :  { %236 = vrot.lane.b32.xlu1 %v235_v32, %s531_s15  ;;  %s374_s15 = smov 3  ;;  %v367_v49 = vld [vmem:[#allocation0 + $0xe] ss:$48 sm:%s366_s14]  }
  0x48   :  { %v375_v50 = vld [vmem:[#allocation0 + $0x1] ss:$48 sm:%s374_s15]  }
  0x4a   :  { %244 = vrot.lane.b32.xlu0 %v243_v33, %s532_s0  ;;  %s381_s0 = smov 3 }
  0x4b   :  { %252 = vrot.lane.b32.xlu1 %v251_v34, %s533_s18  ;;  %s389_s18 = smov 3  ;;  %v382_v51 = vld [vmem:[#allocation0 + $0x27] ss:$48 sm:%s381_s0]  }
  0x4c   :  { %v390_v52 = vld [vmem:[#allocation0 + $0x1a] ss:$48 sm:%s389_s18]  }
  0x4e   :  { %259 = vrot.lane.b32.xlu0 %v258_v35, %s534_s21  ;;  %s397_s21 = smov 3 }
  0x4f   :  { %267 = vrot.lane.b32.xlu1 %v266_v36, %s535_s22  ;;  %s550_s22 = smov 6   ;;  %v398_v53 = vld [vmem:[#allocation0 + $0xd] ss:$48 sm:%s397_s21]  }
  0x52   :  { %275 = vrot.lane.b32.xlu0 %v274_v37, %s536_s25 }
  0x53   :  { %283 = vrot.lane.b32.xlu1 %v282_v38, %s537_s26 }
  0x56   :  { %290 = vrot.lane.b32.xlu0 %v289_v39, %s538_s29 }
  0x57   :  { %298 = vrot.lane.b32.xlu1 %v297_v40, %s539_s30 }
  0x5a   :  { %306 = vrot.lane.b32.xlu0 %v305_v41, %s540_s4 }
  0x5b   :  { %314 = vrot.lane.b32.xlu1 %v313_v42, %s541_s5 }
  0x5e   :  { %321 = vrot.lane.b32.xlu0 %v320_v43, %s542_s8 }
  0x5f   :  { %329 = vrot.lane.b32.xlu1 %v328_v44, %s543_s9 }
  0x62   :  { %337 = vrot.lane.b32.xlu0 %v336_v45, %s544_s12 }
  0x63   :  { %345 = vrot.lane.b32.xlu1 %v344_v46, %s545_s13 }
  0x66   :  { %352 = vrot.lane.b32.xlu0 %v351_v47, %s546_s16 }
  0x67   :  { %360 = vrot.lane.b32.xlu1 %v359_v48, %s547_s17 }
  0x6a   :  { %368 = vrot.lane.b32.xlu0 %v367_v49, %s548_s19 }
  0x6b   :  { %376 = vrot.lane.b32.xlu1 %v375_v50, %s549_s20 }
  0x6e   :  { %383 = vrot.lane.b32.xlu0 %v382_v51, %s550_s22 }
  0x6f   :  { %391 = vrot.lane.b32.xlu1 %v390_v52, %s551_s23 }
  0x72   :  { %399 = vrot.lane.b32.xlu0 %v398_v53, %s552_s24 }
  0x88   :  { %v75_v54 = vpop.permute.xlu0 %74  }
  0x89   :  { %v67_v55 = vpop.permute.xlu1 %66  }
  0x8c   :  { %v25_v57 = vpop.permute.xlu0 %24  }
  0x8d   :  { %v83_v56 = vpop.permute.xlu1 %82   ;;  %28 = vst.msk [vmem:[#allocation2 + $0x18] sm:$0x3] %vm26_vm2, %v25_v57   ;;  %vm145_vm2 = vcmask 769696  }
  0x8e   :  { %31 = vst.msk [vmem:[#allocation2 + $0x10] sm:$0x3] %vm29_vm4, %v25_v57   ;;  %vm161_vm4 = vcmask 736896  }
  0x90   :  { %v41_v59 = vpop.permute.xlu0 %40  }
  0x91   :  { %v57_v58 = vpop.permute.xlu1 %56   ;;  %44 = vst.msk [vmem:[#allocation2 + $0x10] sm:$0x3] %vm22_vm0, %v41_v59   ;;  %vm130_vm0 = vcmask 818896  }
  0x92   :  { %62 = vst.msk [vmem:[#allocation2] sm:$0x3] %vm61_vm5, %v57_v58   ;;  %vm168_vm5 = vcmask 704096  }
  0x93   :  { %47 = vst.msk [vmem:[#allocation2 + $0x8] sm:$0x3] %vm45_vm6, %v41_v59   ;;  %vm176_vm6 = vcmask 687696  }
  0x94   :  { %85 = vst.msk [vmem:[#allocation2] sm:$0x3] %vm84_vm8, %v83_v56   ;;  %v90_v60 = vpop.permute.xlu0 %89   ;;  %vm192_vm8 = vcmask 654896  }
  0x95   :  { %60 = vst.msk [vmem:[#allocation2 + $0x8] sm:$0x3] %vm58_vm9, %v57_v58   ;;  %v98_v61 = vpop.permute.xlu1 %97   ;;  %vm199_vm9 = vcmask 622096  }
  0x96   :  { %70 = vst.msk [vmem:[#allocation2 + $0x10] sm:$0x3] %vm68_vm7, %v67_v55   ;;  %vm184_vm7 = vcmask 671296  }
  0x97   :  { %78 = vst.msk [vmem:[#allocation2 + $0x8] sm:$0x3] %vm76_vm10, %v75_v54   ;;  %vm207_vm10 = vcmask 605696  }
  0x98   :  { %93 = vst.msk [vmem:[#allocation2 + $0x10] sm:$0x3] %vm91_vm11, %v90_v60   ;;  %v106_v62 = vpop.permute.xlu0 %105   ;;  %vm215_vm11 = vcmask 589296  }
  0x99   :  { %101 = vst.msk [vmem:[#allocation2 + $0x8] sm:$0x3] %vm99_vm12, %v98_v61   ;;  %v113_v63 = vpop.permute.xlu1 %112   ;;  %vm223_vm12 = vcmask 572896  }
  0x9a   :  { %108 = vst.msk [vmem:[#allocation2] sm:$0x3] %vm107_vm13, %v106_v62   ;;  %vm230_vm13 = vcmask 540096  }
  0x9b   :  { %116 = vst.msk [vmem:[#allocation2 + $0x10] sm:$0x3] %vm114_vm14, %v113_v63   ;;  %vm238_vm14 = vcmask 523696  }
  0x9c   :  { %v121_v0 = vpop.permute.xlu0 %120  }
  0x9d   :  { %v129_v1 = vpop.permute.xlu1 %128   ;;  %124 = vst.msk [vmem:[#allocation2 + $0x8] sm:$0x3] %vm122_vm15, %v121_v0   ;;  %vm246_vm15 = vcmask 507296  }
  0x9e   :  { %131 = vst.msk [vmem:[#allocation2] sm:$0x3] %vm130_vm0, %v129_v1   ;;  %vm254_vm0 = vcmask 490896  }
  0xa0   :  { %v136_v2 = vpop.permute.xlu0 %135  }
  0xa1   :  { %v144_v3 = vpop.permute.xlu1 %143   ;;  %139 = vst.msk [vmem:[#allocation2 + $0x18] sm:$0x3] %vm137_vm1, %v136_v2   ;;  %vm261_vm1 = vcmask 458096  }
  0xa2   :  { %147 = vst.msk [vmem:[#allocation2 + $0x10] sm:$0x3] %vm145_vm2, %v144_v3   ;;  %vm269_vm2 = vcmask 441696  }
  0xa4   :  { %v152_v4 = vpop.permute.xlu0 %151  }
  0xa5   :  { %v160_v5 = vpop.permute.xlu1 %159   ;;  %155 = vst.msk [vmem:[#allocation2 + $0x8] sm:$0x3] %vm153_vm3, %v152_v4   ;;  %vm277_vm3 = vcmask 425296  }
  0xa6   :  { %162 = vst.msk [vmem:[#allocation2] sm:$0x3] %vm161_vm4, %v160_v5   ;;  %vm285_vm4 = vcmask 408896  }
  0xa8   :  { %v167_v6 = vpop.permute.xlu0 %166  }
  0xa9   :  { %v175_v7 = vpop.permute.xlu1 %174   ;;  %170 = vst.msk [vmem:[#allocation2 + $0x18] sm:$0x3] %vm168_vm5, %v167_v6   ;;  %vm292_vm5 = vcmask 376096  }
  0xaa   :  { %178 = vst.msk [vmem:[#allocation2 + $0x10] sm:$0x3] %vm176_vm6, %v175_v7   ;;  %vm300_vm6 = vcmask 359696  }
  0xac   :  { %v183_v8 = vpop.permute.xlu0 %182  }
  0xad   :  { %v191_v9 = vpop.permute.xlu1 %190   ;;  %186 = vst.msk [vmem:[#allocation2 + $0x8] sm:$0x3] %vm184_vm7, %v183_v8   ;;  %vm308_vm7 = vcmask 343296  }
  0xae   :  { %193 = vst.msk [vmem:[#allocation2] sm:$0x3] %vm192_vm8, %v191_v9   ;;  %vm316_vm8 = vcmask 326896  }
  0xb0   :  { %v198_v10 = vpop.permute.xlu0 %197  }
  0xb1   :  { %v206_v11 = vpop.permute.xlu1 %205   ;;  %201 = vst.msk [vmem:[#allocation2 + $0x18] sm:$0x3] %vm199_vm9, %v198_v10   ;;  %vm323_vm9 = vcmask 294096  }
  0xb2   :  { %209 = vst.msk [vmem:[#allocation2 + $0x10] sm:$0x3] %vm207_vm10, %v206_v11   ;;  %vm331_vm10 = vcmask 277696  }
  0xb4   :  { %v214_v12 = vpop.permute.xlu0 %213  }
  0xb5   :  { %v222_v13 = vpop.permute.xlu1 %221   ;;  %217 = vst.msk [vmem:[#allocation2 + $0x8] sm:$0x3] %vm215_vm11, %v214_v12   ;;  %vm339_vm11 = vcmask 261296  }
  0xb6   :  { %224 = vst.msk [vmem:[#allocation2] sm:$0x3] %vm223_vm12, %v222_v13   ;;  %vm347_vm12 = vcmask 244896  }
  0xb8   :  { %v229_v14 = vpop.permute.xlu0 %228  }
  0xb9   :  { %v237_v15 = vpop.permute.xlu1 %236   ;;  %232 = vst.msk [vmem:[#allocation2 + $0x18] sm:$0x3] %vm230_vm13, %v229_v14   ;;  %vm354_vm13 = vcmask 212096  }
  0xba   :  { %240 = vst.msk [vmem:[#allocation2 + $0x10] sm:$0x3] %vm238_vm14, %v237_v15   ;;  %vm362_vm14 = vcmask 195696  }
  0xbc   :  { %v245_v16 = vpop.permute.xlu0 %244  }
  0xbd   :  { %v253_v17 = vpop.permute.xlu1 %252   ;;  %248 = vst.msk [vmem:[#allocation2 + $0x8] sm:$0x3] %vm246_vm15, %v245_v16   ;;  %vm370_vm15 = vcmask 179296  }
  0xbe   :  { %255 = vst.msk [vmem:[#allocation2] sm:$0x3] %vm254_vm0, %v253_v17   ;;  %vm378_vm0 = vcmask 162896  }
  0xc0   :  { %v260_v18 = vpop.permute.xlu0 %259  }
  0xc1   :  { %v268_v19 = vpop.permute.xlu1 %267   ;;  %263 = vst.msk [vmem:[#allocation2 + $0x18] sm:$0x3] %vm261_vm1, %v260_v18   ;;  %vm385_vm1 = vcmask 130096  }
  0xc2   :  { %271 = vst.msk [vmem:[#allocation2 + $0x10] sm:$0x3] %vm269_vm2, %v268_v19   ;;  %vm393_vm2 = vcmask 113696  }
  0xc4   :  { %v276_v20 = vpop.permute.xlu0 %275  }
  0xc5   :  { %v284_v21 = vpop.permute.xlu1 %283   ;;  %279 = vst.msk [vmem:[#allocation2 + $0x8] sm:$0x3] %vm277_vm3, %v276_v20   ;;  %vm401_vm3 = vcmask 97296  }
  0xc6   :  { %286 = vst.msk [vmem:[#allocation2] sm:$0x3] %vm285_vm4, %v284_v21  }
  0xc8   :  { %v291_v22 = vpop.permute.xlu0 %290  }
  0xc9   :  { %v299_v23 = vpop.permute.xlu1 %298   ;;  %294 = vst.msk [vmem:[#allocation2 + $0x18] sm:$0x3] %vm292_vm5, %v291_v22  }
  0xca   :  { %302 = vst.msk [vmem:[#allocation2 + $0x10] sm:$0x3] %vm300_vm6, %v299_v23  }
  0xcc   :  { %v307_v24 = vpop.permute.xlu0 %306  }
  0xcd   :  { %v315_v25 = vpop.permute.xlu1 %314   ;;  %310 = vst.msk [vmem:[#allocation2 + $0x8] sm:$0x3] %vm308_vm7, %v307_v24  }
  0xce   :  { %317 = vst.msk [vmem:[#allocation2] sm:$0x3] %vm316_vm8, %v315_v25  }
  0xd0   :  { %v322_v26 = vpop.permute.xlu0 %321  }
  0xd1   :  { %v330_v27 = vpop.permute.xlu1 %329   ;;  %325 = vst.msk [vmem:[#allocation2 + $0x18] sm:$0x3] %vm323_vm9, %v322_v26  }
  0xd2   :  { %333 = vst.msk [vmem:[#allocation2 + $0x10] sm:$0x3] %vm331_vm10, %v330_v27  }
  0xd4   :  { %v338_v28 = vpop.permute.xlu0 %337  }
  0xd5   :  { %v346_v29 = vpop.permute.xlu1 %345   ;;  %341 = vst.msk [vmem:[#allocation2 + $0x8] sm:$0x3] %vm339_vm11, %v338_v28  }
  0xd6   :  { %348 = vst.msk [vmem:[#allocation2] sm:$0x3] %vm347_vm12, %v346_v29  }
  0xd8   :  { %v353_v30 = vpop.permute.xlu0 %352  }
  0xd9   :  { %v361_v31 = vpop.permute.xlu1 %360   ;;  %356 = vst.msk [vmem:[#allocation2 + $0x18] sm:$0x3] %vm354_vm13, %v353_v30  }
  0xda   :  { %364 = vst.msk [vmem:[#allocation2 + $0x10] sm:$0x3] %vm362_vm14, %v361_v31  }
  0xdc   :  { %v369_v32 = vpop.permute.xlu0 %368  }
  0xdd   :  { %v377_v33 = vpop.permute.xlu1 %376   ;;  %372 = vst.msk [vmem:[#allocation2 + $0x8] sm:$0x3] %vm370_vm15, %v369_v32  }
  0xde   :  { %379 = vst.msk [vmem:[#allocation2] sm:$0x3] %vm378_vm0, %v377_v33  }
  0xe0   :  { %v384_v34 = vpop.permute.xlu0 %383  }
  0xe1   :  { %v392_v35 = vpop.permute.xlu1 %391   ;;  %387 = vst.msk [vmem:[#allocation2 + $0x18] sm:$0x3] %vm385_vm1, %v384_v34  }
  0xe2   :  { %395 = vst.msk [vmem:[#allocation2 + $0x10] sm:$0x3] %vm393_vm2, %v392_v35  }
  0xe4   :  { %v400_v37 = vpop.permute.xlu0 %399  }
  0xe5   :  { %v407_v36 = vld [vmem:[#allocation2] sm:$0x3]  ;;  %403 = vst.msk [vmem:[#allocation2 + $0x8] sm:$0x3] %vm401_vm3, %v400_v37  }
  0xe6   :  { %409 = vst [vmem:[%s592_s1] sm:$0x3] %v407_v36 }
  0xe8   :  { %v422_v38 = vld [vmem:[#allocation2 + $0x18] sm:$0x3] }
  0xe9   :  { %v416_v39 = vld [vmem:[#allocation2 + $0x10] sm:$0x3]  ;;  %432 = vst [vmem:[%s592_s1 + $0x6] sm:$0x3] %v422_v38 }
  0xea   :  { %431 = vst [vmem:[%s592_s1 + $0x4] sm:$0x3] %v416_v39 }
  0xec   :  { %v411_v40 = vld [vmem:[#allocation2 + $0x8] sm:$0x3] }
  0xed   :  { %430 = vst [vmem:[%s592_s1 + $0x2] sm:$0x3] %v411_v40 }
  0xee   :  { %427 = vsyncpa [#allocation1], 1 }

// kernel: arssr_forward.1
= control target key start
LH: loop header
LB: loop body
LE: loop exit
PB: predicated region body
PF: predicated region fallthrough
CT: control target
= control target key end

     0   :  { %s1718_s9 = smov 0   ;;  %s2096_s0 = inlined_call_operand.vmem [shape: f32[8,1024], index: 0, kind: input, shape index: {}]   ;;  %s2097_s1 = inlined_call_operand.vmem [shape: f32[8,32,32], index: 1, kind: input, shape index: {}]   ;;  %s2098_s2 = inlined_call_operand.vmem [shape: f32[1,1024], index: 2, kind: output, shape index: {}]  }
   0x1 LB: > { %s1483_s10 = sadd.s32 4294967295, %s1681_s9   ;;  %p1487_p0 = scmp.ge.s32.totalorder %s1681_s9, 1  ;;  %s1681_s9 = sphi %s1718_s9, %s12_s9  }
   0x2   : > { %p113_p1 = scmp.lt.s32.totalorder %s1681_s9, 5 }
   0x4   : > { %p114_p2 = pnand %p1487_p0, %p113_p1 }
   0x5   : > { %v1729_v0 = vld [vmem:[%s2097_s1] sm:$0xff] (!%p114_p2)  ;;  %v1683_v1 = vmov (!%p114_p2), 1   ;;  %v1684_v2 = vmov (!%p114_p2), 0   ;;  %v1736_v3 = vld [vmem:[%s2097_s1 + $0x8] sm:$0xff] (!%p114_p2)  ;;  %v1743_v4 = vld [vmem:[%s2097_s1 + $0x10] sm:$0xff] (!%p114_p2)  ;;  %v1685_v6 = vmov (!%p114_p2), 2   ;;  %v203_v21 = vlaneseq (!%p114_p2) }
   0x6   : > { %117 = sbr.rel (%p114_p2) target bundleno = 1847 (0x737), region = 28  ;;  %1628 = vset.pattern.permute.xlu1 (!%p114_p2), %v1683_v1  ;;  %1627 = vset.pattern.permute.xlu0 (!%p114_p2), %v1684_v2  ;;  %v1748_v5 = vld [vmem:[%s2097_s1 + $0x18] sm:$0xff] (!%p114_p2)  ;;  %v1686_v7 = vmov (!%p114_p2), 3   ;;  %v1687_v8 = vmov (!%p114_p2), 5   ;;  %v1688_v9 = vmov (!%p114_p2), 4   ;;  %v1689_v10 = vmov (!%p114_p2), 0.0  }
   0x7   : > { %220 = vperm.xlu1 (!%p114_p2), %1628, %v1729_v0   ;;  %185 = vperm.xlu0 (!%p114_p2), %1627, %v1729_v0   ;;  %v1690_v11 = vmov (!%p114_p2), 6   ;;  %s1488_s19 = sshll.u32 (!%p114_p2), %s1483_s10, 1  ;;  %v1790_v24 = vshrl.u32 (!%p114_p2), %v203_v21, 7  ;;  %vm427_vm0 = vcmask (!%p114_p2), 261120   ;;  %vm1430_vm1 = vcmp.lt.s32.totalorder (!%p114_p2), %v203_v21, 256 }
   0x8   : > { %504 = vmatprep.mubr.f32.mxu0 (!%p114_p2), %v1689_v10  ;;  %629 = vmatprep.mubr.f32.mxu1 (!%p114_p2), %v1689_v10  ;;  %p135_p3 = scmp.lt.s32.totalorder (!%p114_p2), %s1488_s19, 7 }
   0x9   : > { %v237_v26 = vsub.s32 (!%p114_p2), 4, %v1790_v24  ;;  %v205_v27 = vsub.s32 (!%p114_p2), 3, %v1790_v24  ;;  %v301_v32 = vsub.s32 (!%p114_p2), 0, %v1790_v24  ;;  %v341_v38 = vsub.s32 (!%p114_p2), 1, %v1790_v24 }
   0xa   : > { %v381_v46 = vsub.s32 (!%p114_p2), 2, %v1790_v24 }
   0xb   : > { %224 = vperm.xlu1 (!%p114_p2), %1628, %v1736_v3   ;;  %190 = vperm.xlu0 (!%p114_p2), %1627, %v1736_v3  }
   0xd   : > { %s2100_s19 = smov (!%p135_p3, %s1488_s19), 7 }
   0xe   : > { %s1489_s20 = sshll.u32 %s2100_s19, 3  ;;  %s143_s4 = scalar_lea.vmem %s2098_s2, %s2100_s19 }
   0xf   : > { %1629 = vset.pattern.permute.xlu1 %v1684_v2  ;;  %195 = vperm.xlu0 %1627, %v1743_v4   ;;  %s138_s23 = scalar_lea.vmem %s2096_s0, %s1489_s20 }
  0x10   : > { %200 = vperm.xlu1 %1629, %v1748_v5   ;;  %v145_v28 = vld [vmem:[%s138_s23] sm:$0xff]  ;;  %v146_v29 = vld [vmem:[%s138_s23 + $0x8] sm:$0xff] }
  0x11   : > { %v1800_v33 = vrot.slane %v145_v28, %v237_v26  ;;  %v1802_v34 = vrot.slane %v146_v29, %v237_v26  ;;  %v1804_v35 = vrot.slane %v145_v28, %v205_v27  ;;  %v1806_v36 = vrot.slane %v146_v29, %v205_v27 }
  0x12   : > { %v1809_v39 = vrot.slane %v145_v28, %v301_v32  ;;  %v1811_v40 = vrot.slane %v146_v29, %v301_v32  ;;  %v1820_v47 = vrot.slane %v145_v28, %v341_v38  ;;  %v1822_v48 = vrot.slane %v146_v29, %v341_v38 }
  0x13   : > { %1630 = vset.pattern.permute.xlu0 %v1683_v1  ;;  %v1830_v59 = vrot.slane %v145_v28, %v381_v46  ;;  %v1832_v60 = vrot.slane %v146_v29, %v381_v46 }
  0x14   : > { %1631 = vset.pattern.permute.xlu1 %v1683_v1  ;;  %228 = vperm.xlu0 %1630, %v1743_v4  }
  0x15   : > { %232 = vperm.xlu1 %1631, %v1748_v5  }
  0x18   : > { %1633 = vset.pattern.permute.xlu0 %v1685_v6 }
  0x19   : > { %1632 = vset.pattern.permute.xlu1 %v1685_v6  ;;  %264 = vperm.xlu0 %1633, %v1736_v3  }
  0x1a   : > { %260 = vperm.xlu1 %1632, %v1729_v0  }
  0x1d   : > { %272 = vperm.xlu0 %1633, %v1748_v5  }
  0x1e   : > { %1634 = vset.pattern.permute.xlu1 %v1686_v7 }
  0x1f   : > { %284 = vperm.xlu1 %1634, %v1729_v0  }
  0x21   : > { %1638 = vset.pattern.permute.xlu0 %v1687_v8 }
  0x22   : > { %364 = vperm.xlu0 %1638, %v1729_v0  }
  0x23   : > { %288 = vperm.xlu1 %1634, %v1736_v3  }
  0x26   : > { %1639 = vset.pattern.permute.xlu0 %v1688_v9 }
  0x27   : > { %1635 = vset.pattern.permute.xlu1 %v1688_v9  ;;  %324 = vperm.xlu0 %1639, %v1729_v0  }
  0x28   : > { %328 = vperm.xlu1 %1635, %v1736_v3  }
  0x2b   : > { %336 = vperm.xlu0 %1639, %v1748_v5  }
  0x2c   : > { %1636 = vset.pattern.permute.xlu1 %v1685_v6 }
  0x2d   : > { %268 = vperm.xlu1 %1636, %v1743_v4  }
  0x2f   : > { %1643 = vset.pattern.permute.xlu0 %v1690_v11 }
  0x30   : > { %412 = vperm.xlu0 %1643, %v1729_v0  }
  0x31   : > { %1637 = vset.pattern.permute.xlu1 %v1686_v7 }
  0x32   : > { %292 = vperm.xlu1 %1637, %v1743_v4  }
  0x34   : > { %424 = vperm.xlu0 %1643, %v1748_v5  }
  0x36   : > { %296 = vperm.xlu1 %1637, %v1748_v5  }
  0x3a   : > { %1640 = vset.pattern.permute.xlu1 %v1687_v8 }
  0x3b   : > { %368 = vperm.xlu1 %1640, %v1736_v3  }
  0x3f   : > { %1641 = vset.pattern.permute.xlu1 %v1688_v9 }
  0x40   : > { %332 = vperm.xlu1 %1641, %v1743_v4  }
  0x44   : > { %1642 = vset.pattern.permute.xlu1 %v1687_v8 }
  0x45   : > { %372 = vperm.xlu1 %1642, %v1743_v4  }
  0x49   : > { %376 = vperm.xlu1 %1642, %v1748_v5  }
  0x4d   : > { %1644 = vset.pattern.permute.xlu1 %v1690_v11 }
  0x4e   : > { %416 = vperm.xlu1 %1644, %v1736_v3  }
  0x52   : > { %420 = vperm.xlu1 %1644, %v1743_v4  }
  0x86   : > { %v221_v12 = vpop.permute.xlu1 %220  ;;  %v186_v13 = vpop.permute.xlu0 %185 }
  0x87   : > { %v243_v42 = vmul.f32 %v1800_v33, %v221_v12  ;;  %v244_v43 = vmul.f32 %v1802_v34, %v221_v12  ;;  %v211_v44 = vmul.f32 %v1804_v35, %v186_v13  ;;  %v212_v45 = vmul.f32 %v1806_v36, %v186_v13 }
  0x89   : > { %v251_v54 = vadd.f32 %v243_v42, %v211_v44  ;;  %v252_v55 = vadd.f32 %v244_v43, %v212_v45 }
  0x8a   : > { %v225_v14 = vpop.permute.xlu1 %224  ;;  %v191_v16 = vpop.permute.xlu0 %190 }
  0x8b   : > { %v245_v49 = vmul.f32 %v1800_v33, %v225_v14  ;;  %v246_v50 = vmul.f32 %v1802_v34, %v225_v14  ;;  %v213_v51 = vmul.f32 %v1804_v35, %v191_v16  ;;  %v214_v52 = vmul.f32 %v1806_v36, %v191_v16 }
  0x8d   : > { %v253_v2 = vadd.f32 %v245_v49, %v213_v51  ;;  %v254_v6 = vadd.f32 %v246_v50, %v214_v52 }
  0x8e   : > { %v1778_v17 = vpop.permute.xlu0 %195 }
  0x8f   : > { %v1776_v15 = vpop.permute.xlu1 %200  ;;  %v216_v38 = vmul.f32 %v1806_v36, %v1778_v17 }
  0x93   : > { %v1784_v20 = vpop.permute.xlu0 %228 }
  0x94   : > { %v1780_v18 = vpop.permute.xlu1 %232 }
  0x95   : > { %v249_v50 = vmul.f32 %v1800_v33, %v1780_v18 }
  0x98   : > { %v265_v23 = vpop.permute.xlu0 %264 }
  0x99   : > { %v261_v19 = vpop.permute.xlu1 %260  ;;  %v277_v13 = vadd.f32 %v265_v23, %v253_v2  ;;  %v278_v14 = vadd.f32 %v265_v23, %v254_v6  ;;  %v247_v23 = vmul.f32 %v1800_v33, %v1784_v20 }
  0x9a   : > { %v275_v61 = vadd.f32 %v261_v19, %v251_v54  ;;  %v276_v62 = vadd.f32 %v261_v19, %v252_v55 }
  0x9c   : > { %v1797_v30 = vpop.permute.xlu0 %272 }
  0x9e   : > { %v285_v22 = vpop.permute.xlu1 %284 }
  0x9f   : > { %v307_v56 = vmul.f32 %v1809_v39, %v285_v22  ;;  %v308_v57 = vmul.f32 %v1811_v40, %v285_v22 }
  0xa1   : > { %v365_v37 = vpop.permute.xlu0 %364  ;;  %v315_v9 = vadd.f32 %v307_v56, %v275_v61  ;;  %v316_v11 = vadd.f32 %v308_v57, %v276_v62 }
  0xa2   : > { %v289_v25 = vpop.permute.xlu1 %288  ;;  %v387_v19 = vmul.f32 %v1830_v59, %v365_v37  ;;  %v388_v26 = vmul.f32 %v1832_v60, %v365_v37 }
  0xa3   : > { %v309_v7 = vmul.f32 %v1809_v39, %v289_v25  ;;  %v310_v8 = vmul.f32 %v1811_v40, %v289_v25  ;;  %v215_v25 = vmul.f32 %v1804_v35, %v1778_v17  ;;  %v250_v17 = vmul.f32 %v1802_v34, %v1780_v18 }
  0xa5   : > { %v317_v29 = vadd.f32 %v309_v7, %v277_v13  ;;  %v318_v32 = vadd.f32 %v310_v8, %v278_v14  ;;  %v255_v54 = vadd.f32 %v247_v23, %v215_v25 }
  0xa6   : > { %v325_v53 = vpop.permute.xlu0 %324 }
  0xa7   : > { %v329_v31 = vpop.permute.xlu1 %328  ;;  %v347_v63 = vmul.f32 %v1820_v47, %v325_v53  ;;  %v348_v1 = vmul.f32 %v1822_v48, %v325_v53  ;;  %v218_v53 = vmul.f32 %v1806_v36, %v1776_v15 }
  0xa8   : > { %v349_v16 = vmul.f32 %v1820_v47, %v329_v31  ;;  %v350_v22 = vmul.f32 %v1822_v48, %v329_v31  ;;  %v248_v31 = vmul.f32 %v1802_v34, %v1784_v20  ;;  %v217_v20 = vmul.f32 %v1804_v35, %v1776_v15 }
  0xa9   : > { %v355_v27 = vadd.f32 %v347_v63, %v315_v9  ;;  %v356_v28 = vadd.f32 %v348_v1, %v316_v11  ;;  %v258_v2 = vadd.f32 %v250_v17, %v218_v53 }
  0xaa   : > { %v357_v42 = vadd.f32 %v349_v16, %v317_v29  ;;  %v358_v43 = vadd.f32 %v350_v22, %v318_v32  ;;  %v256_v55 = vadd.f32 %v248_v31, %v216_v38  ;;  %v257_v1 = vadd.f32 %v249_v50, %v217_v20  ;;  %v337_v9 = vpop.permute.xlu0 %336 }
  0xab   : > { %v396_v46 = vadd.f32 %v388_v26, %v356_v28  ;;  %v395_v49 = vadd.f32 %v387_v19, %v355_v27  ;;  %v282_v14 = vadd.f32 %v1797_v30, %v258_v2  ;;  %v354_v28 = vmul.f32 %v1822_v48, %v337_v9 }
  0xac   : > { %v1813_v41 = vpop.permute.xlu1 %268  ;;  %v281_v13 = vadd.f32 %v1797_v30, %v257_v1 }
  0xad   : > { %v404_v57 = vmax.f32 %v396_v46, 0.0  ;;  %v403_v62 = vmax.f32 %v395_v49, 0.0  ;;  %v279_v16 = vadd.f32 %v1813_v41, %v255_v54  ;;  %v280_v22 = vadd.f32 %v1813_v41, %v256_v55  ;;  %v1491_v55 = vld [vmem:[%s2097_s1 + $0x20] sm:$0xff] }
  0xb1   : > { %v293_v58 = vpop.permute.xlu1 %292 }
  0xb2   : > { %v311_v7 = vmul.f32 %v1809_v39, %v293_v58  ;;  %v312_v8 = vmul.f32 %v1811_v40, %v293_v58  ;;  %v353_v58 = vmul.f32 %v1820_v47, %v337_v9 }
  0xb4   : > { %v319_v32 = vadd.f32 %v311_v7, %v279_v16  ;;  %v320_v25 = vadd.f32 %v312_v8, %v280_v22 }
  0xb5   : > { %v297_v12 = vpop.permute.xlu1 %296 }
  0xb6   : > { %v313_v6 = vmul.f32 %v1809_v39, %v297_v12  ;;  %v314_v18 = vmul.f32 %v1811_v40, %v297_v12 }
  0xb8   : > { %v321_v12 = vadd.f32 %v313_v6, %v281_v13  ;;  %v322_v27 = vadd.f32 %v314_v18, %v282_v14 }
  0xba   : > { %v369_v44 = vpop.permute.xlu1 %368  ;;  %v361_v31 = vadd.f32 %v353_v58, %v321_v12 }
  0xbb   : > { %v389_v37 = vmul.f32 %v1830_v59, %v369_v44  ;;  %v390_v45 = vmul.f32 %v1832_v60, %v369_v44 }
  0xbd   : > { %v397_v51 = vadd.f32 %v389_v37, %v357_v42  ;;  %v398_v52 = vadd.f32 %v390_v45, %v358_v43  ;;  %v362_v42 = vadd.f32 %v354_v28, %v322_v27 }
  0xbf   : > { %v333_v56 = vpop.permute.xlu1 %332  ;;  %v406_v61 = vmax.f32 %v398_v52, 0.0  ;;  %v405_v63 = vmax.f32 %v397_v51, 0.0 }
  0xc0   : > { %v351_v19 = vmul.f32 %v1820_v47, %v333_v56  ;;  %v352_v26 = vmul.f32 %v1822_v48, %v333_v56  ;;  %v1492_v56 = vld [vmem:[%s2097_s1 + $0x28] sm:$0xff] }
  0xc1   : > { %v1543_v11 = vpack.c.bf16 %v406_v61, %v404_v57  ;;  %v1545_v15 = vpack.c.bf16 %v405_v63, %v403_v62  ;;  %v1493_v57 = vld [vmem:[%s2097_s1 + $0x30] sm:$0xff]  ;;  %v1494_v61 = vld [vmem:[%s2097_s1 + $0x38] sm:$0xff]  ;;  %v1691_v62 = vmov 7   ;;  %v413_v63 = vpop.permute.xlu0 %412 }
  0xc2   : > { %v359_v41 = vadd.f32 %v351_v19, %v319_v32  ;;  %v360_v23 = vadd.f32 %v352_v26, %v320_v25  ;;  %1645 = vset.pattern.permute.xlu1 %v1691_v62  ;;  %1646 = vset.pattern.permute.xlu0 %v1691_v62 }
  0xc3   : > { %1544 = vmatprep.subr.bf16.mxu0 %v1543_v11  ;;  %538 = vperm.xlu1 %1645, %v1729_v0  }
  0xc4   : > { %v373_v29 = vpop.permute.xlu1 %372  ;;  %1546 = vmatpush1.bf16.msra.mxu0 %v1545_v15  ;;  %542 = vperm.xlu0 %1646, %v1736_v3  }
  0xc5   : > { %v391_v30 = vmul.f32 %v1830_v59, %v373_v29  ;;  %v392_v38 = vmul.f32 %v1832_v60, %v373_v29  ;;  %v425_v29 = vpop.permute.xlu0 %424 }
  0xc7   : > { %v399_v44 = vadd.f32 %v391_v30, %v359_v41  ;;  %v400_v37 = vadd.f32 %v392_v38, %v360_v23  ;;  %546 = vperm.xlu1 %1645, %v1743_v4  }
  0xc8   : > { %v377_v43 = vpop.permute.xlu1 %376 }
  0xc9   : > { %v393_v45 = vmul.f32 %v1830_v59, %v377_v43  ;;  %v394_v46 = vmul.f32 %v1832_v60, %v377_v43  ;;  %v407_v17 = vmax.f32 %v399_v44, 0.0  ;;  %v408_v51 = vmax.f32 %v400_v37, 0.0 }
  0xcb   : > { %v401_v49 = vadd.f32 %v393_v45, %v361_v31  ;;  %v402_v50 = vadd.f32 %v394_v46, %v362_v42  ;;  %550 = vperm.xlu1 %1645, %v1748_v5   ;;  %v1495_v45 = vld [vmem:[%s2097_s1 + $0x40] sm:$0xff]  ;;  %v1496_v46 = vld [vmem:[%s2097_s1 + $0x48] sm:$0xff] }
  0xcd   : > { %v409_v52 = vmax.f32 %v401_v49, 0.0  ;;  %v410_v20 = vmax.f32 %v402_v50, 0.0  ;;  %v417_v6 = vpop.permute.xlu1 %416  ;;  %v1497_v49 = vld [vmem:[%s2097_s1 + $0x50] sm:$0xff]  ;;  %v1498_v50 = vld [vmem:[%s2097_s1 + $0x58] sm:$0xff] }
  0xcf   : > { %v1547_v53 = vpack.c.bf16 %v410_v20, %v408_v51  ;;  %v1549_v54 = vpack.c.bf16 %v409_v52, %v407_v17  ;;  %v1692_v17 = vmov 8   ;;  %v1693_v51 = vmov 9  }
  0xd0   : > { %1647 = vset.pattern.permute.xlu0 %v1692_v17  ;;  %1648 = vset.pattern.permute.xlu1 %v1692_v17 }
  0xd1   : > { %1548 = vmatprep.subr.bf16.mxu0 %v1547_v53  ;;  %v421_v19 = vpop.permute.xlu1 %420  ;;  %663 = vperm.xlu0 %1647, %v1729_v0  }
  0xd2   : > { %1550 = vmatpush1.bf16.msra.mxu0 %v1549_v54  ;;  %667 = vperm.xlu1 %1648, %v1736_v3  }
  0xd5   : > { %1516 = vmatmul.mubr.msk.f32.vlgmr.msra.gmra.mrb[0].mxu0 %vm427_vm0, %v1491_v55  ;;  %675 = vperm.xlu0 %1647, %v1748_v5  }
  0xd6   : > { %510 = vmatprep.mubr.f32.mxu0 %v1689_v10  ;;  %671 = vperm.xlu1 %1648, %v1743_v4  }
  0xd9   : > { %1517 = vmatmul.mubr.msk.f32.gmra.mrb[2].mxu0 %vm427_vm0, %v1492_v56  ;;  %1650 = vset.pattern.permute.xlu0 %v1693_v51 }
  0xda   : > { %516 = vmatprep.mubr.f32.mxu0 %v1689_v10  ;;  %1649 = vset.pattern.permute.xlu1 %v1693_v51 }
  0xdb   : > { %788 = vperm.xlu1 %1649, %v1729_v0   ;;  %792 = vperm.xlu0 %1650, %v1736_v3  }
  0xdd   : > { %1518 = vmatmul.mubr.msk.f32.gmra.mrb[4].mxu0 %vm427_vm0, %v1493_v57 }
  0xde   : > { %522 = vmatprep.mubr.f32.mxu0 %v1689_v10 }
  0xdf   : > { %796 = vperm.xlu0 %1650, %v1743_v4  }
  0xe1   : > { %1519 = vmatmul.mubr.msk.f32.gmra.mrb[6].mxu0 %vm427_vm0, %v1494_v61 }
  0xe2   : > { %754 = vmatprep.mubr.f32.mxu0 %v1689_v10 }
 0x142   : > { %v539_v52 = vpop.permute.xlu1 %538 }
 0x143   : > { %v543_v54 = vpop.permute.xlu0 %542 }
 0x1a8   : > { %v506_v1 = vpop.f32.mrb[0].mxu0 }
 0x1a9   : > { %v508_v2 = vpop.f32.mrb[1].mxu0  ;;  %v507_v18 = vadd.f32 %v506_v1, %v413_v63 }
 0x1aa   : > { %v509_v7 = vadd.f32 %v508_v2, %v413_v63  ;;  %v547_v63 = vpop.permute.xlu1 %546 }
 0x1ab   : > { %v529_v13 = vmax.f32 %v507_v18, 0.0 }
 0x1ac   : > { %v512_v8 = vpop.f32.mrb[2].mxu0  ;;  %v530_v16 = vmax.f32 %v509_v7, 0.0 }
 0x1ad   : > { %v513_v9 = vadd.f32 %v512_v8, %v417_v6  ;;  %v514_v11 = vpop.f32.mrb[3].mxu0 }
 0x1ae   : > { %v515_v15 = vadd.f32 %v514_v11, %v417_v6 }
 0x1af   : > { %v531_v14 = vmax.f32 %v513_v9, 0.0 }
 0x1b0   : > { %v532_v22 = vmax.f32 %v515_v15, 0.0  ;;  %v518_v26 = vpop.f32.mrb[4].mxu0 }
 0x1b1   : > { %v520_v12 = vpop.f32.mrb[5].mxu0  ;;  %v1553_v27 = vpack.c.bf16 %v531_v14, %v529_v13  ;;  %v519_v28 = vadd.f32 %v518_v26, %v421_v19  ;;  %v551_v14 = vpop.permute.xlu1 %550 }
 0x1b2   : > { %v1551_v58 = vpack.c.bf16 %v532_v22, %v530_v16  ;;  %v521_v32 = vadd.f32 %v520_v12, %v421_v19 }
 0x1b3   : > { %v533_v23 = vmax.f32 %v519_v28, 0.0 }
 0x1b4   : > { %v524_v25 = vpop.f32.mrb[6].mxu0  ;;  %1552 = vmatprep.subr.bf16.mxu1 %v1551_v58  ;;  %v534_v42 = vmax.f32 %v521_v32, 0.0 }
 0x1b5   : > { %v525_v30 = vadd.f32 %v524_v25, %v425_v29  ;;  %v526_v38 = vpop.f32.mrb[7].mxu0  ;;  %1554 = vmatpush1.bf16.msra.mxu1 %v1553_v27 }
 0x1b6   : > { %v527_v41 = vadd.f32 %v526_v38, %v425_v29  ;;  %v1500_v38 = vld [vmem:[%s2097_s1 + $0x68] sm:$0xff] }
 0x1b7   : > { %v535_v31 = vmax.f32 %v525_v30, 0.0  ;;  %v1499_v30 = vld [vmem:[%s2097_s1 + $0x60] sm:$0xff] }
 0x1b8   : > { %v536_v43 = vmax.f32 %v527_v41, 0.0  ;;  %v1501_v41 = vld [vmem:[%s2097_s1 + $0x70] sm:$0xff] }
 0x1b9   : > { %v1557_v44 = vpack.c.bf16 %v535_v31, %v533_v23  ;;  %v1502_v23 = vld [vmem:[%s2097_s1 + $0x78] sm:$0xff]  ;;  %v1694_v31 = vmov 10  }
 0x1ba   : > { %v1555_v37 = vpack.c.bf16 %v536_v43, %v534_v42  ;;  %1651 = vset.pattern.permute.xlu1 %v1694_v31  ;;  %1653 = vset.pattern.permute.xlu0 %v1694_v31  ;;  %v1695_v42 = vmov 11   ;;  %v1696_v43 = vmov 12  }
 0x1bb   : > { %812 = vperm.xlu1 %1651, %v1729_v0   ;;  %820 = vperm.xlu0 %1653, %v1743_v4  }
 0x1bc   : > { %1556 = vmatprep.subr.bf16.mxu1 %v1555_v37  ;;  %v1698_v37 = vmov 14  }
 0x1bd   : > { %1558 = vmatpush1.bf16.msra.mxu1 %v1557_v44  ;;  %v1697_v44 = vmov 13  }
 0x1bf   : > { %816 = vperm.xlu1 %1651, %v1736_v3   ;;  %1656 = vset.pattern.permute.xlu0 %v1695_v42 }
 0x1c0   : > { %1520 = vmatmul.mubr.msk.f32.vlgmr.msra.gmra.mrb[0].mxu1 %vm427_vm0, %v1495_v45  ;;  %848 = vperm.xlu0 %1656, %v1736_v3   ;;  %v664_v45 = vpop.permute.xlu0 %663 }
 0x1c1   : > { %635 = vmatprep.mubr.f32.mxu1 %v1689_v10 }
 0x1c3   : > { %1652 = vset.pattern.permute.xlu1 %v1693_v51 }
 0x1c4   : > { %1521 = vmatmul.mubr.msk.f32.gmra.mrb[2].mxu1 %vm427_vm0, %v1496_v46  ;;  %800 = vperm.xlu1 %1652, %v1748_v5  }
 0x1c5   : > { %641 = vmatprep.mubr.f32.mxu1 %v1689_v10  ;;  %856 = vperm.xlu0 %1656, %v1748_v5  }
 0x1c8   : > { %1522 = vmatmul.mubr.msk.f32.gmra.mrb[4].mxu1 %vm427_vm0, %v1497_v49  ;;  %1654 = vset.pattern.permute.xlu1 %v1694_v31 }
 0x1c9   : > { %647 = vmatprep.mubr.f32.mxu1 %v1689_v10  ;;  %824 = vperm.xlu1 %1654, %v1748_v5  }
 0x1ca   : > { %1661 = vset.pattern.permute.xlu0 %v1698_v37 }
 0x1cb   : > { %932 = vperm.xlu0 %1661, %v1729_v0  }
 0x1cc   : > { %1523 = vmatmul.mubr.msk.f32.gmra.mrb[6].mxu1 %vm427_vm0, %v1498_v50  ;;  %v668_v50 = vpop.permute.xlu1 %667 }
 0x1cd   : > { %1039 = vmatprep.mubr.f32.mxu1 %v1689_v10  ;;  %1655 = vset.pattern.permute.xlu1 %v1695_v42 }
 0x1ce   : > { %844 = vperm.xlu1 %1655, %v1729_v0  }
 0x1cf   : > { %1662 = vset.pattern.permute.xlu0 %v1697_v44 }
 0x1d0   : > { %900 = vperm.xlu0 %1662, %v1729_v0  }
 0x1d2   : > { %1657 = vset.pattern.permute.xlu1 %v1696_v43 }
 0x1d3   : > { %868 = vperm.xlu1 %1657, %v1729_v0  }
 0x1d4   : > { %912 = vperm.xlu0 %1662, %v1748_v5  }
 0x1d7   : > { %872 = vperm.xlu1 %1657, %v1736_v3  }
 0x1db   : > { %1658 = vset.pattern.permute.xlu1 %v1697_v44 }
 0x1dc   : > { %904 = vperm.xlu1 %1658, %v1736_v3  }
 0x1e0   : > { %1659 = vset.pattern.permute.xlu1 %v1695_v42 }
 0x1e1   : > { %852 = vperm.xlu1 %1659, %v1743_v4  }
 0x1e5   : > { %1660 = vset.pattern.permute.xlu1 %v1696_v43 }
 0x1e6   : > { %876 = vperm.xlu1 %1660, %v1743_v4  }
 0x1ea   : > { %880 = vperm.xlu1 %1660, %v1748_v5  }
 0x1ee   : > { %1663 = vset.pattern.permute.xlu1 %v1698_v37 }
 0x1ef   : > { %936 = vperm.xlu1 %1663, %v1736_v3  }
 0x1f3   : > { %1664 = vset.pattern.permute.xlu1 %v1697_v44 }
 0x1f4   : > { %908 = vperm.xlu1 %1664, %v1743_v4  }
 0x1f8   : > { %1665 = vset.pattern.permute.xlu1 %v1698_v37 }
 0x1f9   : > { %940 = vperm.xlu1 %1665, %v1743_v4  }
 0x1fd   : > { %944 = vperm.xlu1 %1665, %v1748_v5  }
 0x293   : > { %v631_v20 = vpop.f32.mrb[0].mxu1 }
 0x294   : > { %v633_v53 = vpop.f32.mrb[1].mxu1  ;;  %v632_v55 = vadd.f32 %v631_v20, %v539_v52 }
 0x295   : > { %v634_v56 = vadd.f32 %v633_v53, %v539_v52 }
 0x296   : > { %v654_v2 = vmax.f32 %v632_v55, 0.0 }
 0x297   : > { %v637_v57 = vpop.f32.mrb[2].mxu1  ;;  %v655_v18 = vmax.f32 %v634_v56, 0.0 }
 0x298   : > { %v638_v61 = vadd.f32 %v637_v57, %v543_v54  ;;  %v639_v62 = vpop.f32.mrb[3].mxu1 }
 0x299   : > { %v640_v1 = vadd.f32 %v639_v62, %v543_v54 }
 0x29a   : > { %v656_v6 = vmax.f32 %v638_v61, 0.0  ;;  %v672_v61 = vpop.permute.xlu1 %671 }
 0x29b   : > { %v657_v7 = vmax.f32 %v640_v1, 0.0  ;;  %v643_v8 = vpop.f32.mrb[4].mxu1 }
 0x29c   : > { %v1561_v9 = vpack.c.bf16 %v656_v6, %v654_v2  ;;  %v645_v11 = vpop.f32.mrb[5].mxu1  ;;  %v644_v13 = vadd.f32 %v643_v8, %v547_v63 }
 0x29d   : > { %v1559_v15 = vpack.c.bf16 %v657_v7, %v655_v18  ;;  %v646_v16 = vadd.f32 %v645_v11, %v547_v63  ;;  %v676_v7 = vpop.permute.xlu0 %675 }
 0x29e   : > { %v658_v27 = vmax.f32 %v644_v13, 0.0 }
 0x29f   : > { %v649_v22 = vpop.f32.mrb[6].mxu1  ;;  %1560 = vmatprep.subr.bf16.mxu0 %v1559_v15  ;;  %v659_v28 = vmax.f32 %v646_v16, 0.0 }
 0x2a0   : > { %v650_v19 = vadd.f32 %v649_v22, %v551_v14  ;;  %v651_v26 = vpop.f32.mrb[7].mxu1  ;;  %1562 = vmatpush1.bf16.msra.mxu0 %v1561_v9 }
 0x2a1   : > { %v652_v12 = vadd.f32 %v651_v26, %v551_v14  ;;  %v793_v43 = vpop.permute.xlu0 %792 }
 0x2a2   : > { %v660_v58 = vmax.f32 %v650_v19, 0.0 }
 0x2a3   : > { %v661_v29 = vmax.f32 %v652_v12, 0.0 }
 0x2a4   : > { %v1565_v32 = vpack.c.bf16 %v660_v58, %v658_v27  ;;  %v1503_v27 = vld [vmem:[%s2097_s1 + $0x80] sm:$0xff]  ;;  %v1504_v58 = vld [vmem:[%s2097_s1 + $0x88] sm:$0xff] }
 0x2a5   : > { %v1563_v25 = vpack.c.bf16 %v661_v29, %v659_v28  ;;  %v1505_v28 = vld [vmem:[%s2097_s1 + $0x90] sm:$0xff]  ;;  %v1506_v29 = vld [vmem:[%s2097_s1 + $0x98] sm:$0xff]  ;;  %v797_v37 = vpop.permute.xlu0 %796 }
 0x2a7   : > { %1564 = vmatprep.subr.bf16.mxu0 %v1563_v25  ;;  %v789_v25 = vpop.permute.xlu1 %788 }
 0x2a8   : > { %1566 = vmatpush1.bf16.msra.mxu0 %v1565_v32  ;;  %v1699_v32 = vmov 15  }
 0x2a9   : > { %1666 = vset.pattern.permute.xlu0 %v1699_v32  ;;  %1667 = vset.pattern.permute.xlu1 %v1699_v32 }
 0x2aa   : > { %1081 = vperm.xlu0 %1666, %v1729_v0   ;;  %1085 = vperm.xlu1 %1667, %v1736_v3  }
 0x2ab   : > { %1524 = vmatmul.mubr.msk.f32.vlgmr.msra.gmra.mrb[8].mxu0 %vm427_vm0, %v1499_v30  ;;  %v813_v30 = vpop.permute.xlu1 %812 }
 0x2ac   : > { %760 = vmatprep.mubr.f32.mxu0 %v1689_v10 }
 0x2ae   : > { %1089 = vperm.xlu1 %1667, %v1743_v4   ;;  %1093 = vperm.xlu0 %1666, %v1748_v5   ;;  %v803_v4 = vmul.f32 %v789_v25, %v1804_v35  ;;  %v827_v5 = vmul.f32 %v813_v30, %v1800_v33 }
 0x2af   : > { %1525 = vmatmul.mubr.msk.f32.gmra.mrb[10].mxu0 %vm427_vm0, %v1500_v38  ;;  %v817_v38 = vpop.permute.xlu1 %816 }
 0x2b0   : > { %766 = vmatprep.mubr.f32.mxu0 %v1689_v10 }
 0x2b3   : > { %1526 = vmatmul.mubr.msk.f32.gmra.mrb[12].mxu0 %vm427_vm0, %v1501_v41  ;;  %v801_v41 = vpop.permute.xlu1 %800 }
 0x2b4   : > { %772 = vmatprep.mubr.f32.mxu0 %v1689_v10 }
 0x2b7   : > { %1527 = vmatmul.mubr.msk.f32.gmra.mrb[14].mxu0 %vm427_vm0, %v1502_v23  ;;  %v825_v23 = vpop.permute.xlu1 %824 }
 0x2b8   : > { %1172 = vmatprep.mubr.f32.mxu0 %v1689_v10 }
 0x2bb   : > { %v845_v31 = vpop.permute.xlu1 %844 }
 0x2bf   : > { %v869_v42 = vpop.permute.xlu1 %868 }
 0x2c3   : > { %v873_v44 = vpop.permute.xlu1 %872 }
 0x37e   : > { %v756_v46 = vpop.f32.mrb[8].mxu0 }
 0x37f   : > { %v758_v49 = vpop.f32.mrb[9].mxu0  ;;  %v757_v17 = vadd.f32 %v756_v46, %v664_v45  ;;  %v821_v46 = vpop.permute.xlu0 %820 }
 0x380   : > { %v759_v51 = vadd.f32 %v758_v49, %v664_v45  ;;  %v905_v45 = vpop.permute.xlu1 %904 }
 0x381   : > { %v779_v55 = vmax.f32 %v757_v17, 0.0 }
 0x382   : > { %v762_v52 = vpop.f32.mrb[10].mxu0  ;;  %v780_v57 = vmax.f32 %v759_v51, 0.0  ;;  %v804_v51 = vmul.f32 %v789_v25, %v1806_v36 }
 0x383   : > { %v763_v20 = vadd.f32 %v762_v52, %v668_v50  ;;  %v764_v53 = vpop.f32.mrb[11].mxu0  ;;  %v849_v0 = vpop.permute.xlu0 %848  ;;  %v828_v52 = vmul.f32 %v813_v30, %v1802_v34 }
 0x384   : > { %v765_v54 = vadd.f32 %v764_v53, %v668_v50  ;;  %v853_v49 = vpop.permute.xlu1 %852  ;;  %v805_v53 = vmul.f32 %v793_v43, %v1804_v35 }
 0x385   : > { %v781_v56 = vmax.f32 %v763_v20, 0.0  ;;  %v829_v20 = vmul.f32 %v817_v38, %v1800_v33 }
 0x386   : > { %v782_v62 = vmax.f32 %v765_v54, 0.0  ;;  %v768_v63 = vpop.f32.mrb[12].mxu0  ;;  %v830_v54 = vmul.f32 %v817_v38, %v1802_v34 }
 0x387   : > { %v1569_v1 = vpack.c.bf16 %v781_v56, %v779_v55  ;;  %v770_v2 = vpop.f32.mrb[13].mxu0  ;;  %v769_v18 = vadd.f32 %v768_v63, %v672_v61  ;;  %v857_v3 = vpop.permute.xlu0 %856  ;;  %v806_v55 = vmul.f32 %v793_v43, %v1806_v36  ;;  %v837_v63 = vadd.f32 %v829_v20, %v805_v53 }
 0x388   : > { %v1567_v6 = vpack.c.bf16 %v782_v62, %v780_v57  ;;  %v771_v8 = vadd.f32 %v770_v2, %v672_v61  ;;  %v877_v50 = vpop.permute.xlu1 %876  ;;  %v835_v57 = vadd.f32 %v827_v5, %v803_v4  ;;  %v836_v61 = vadd.f32 %v828_v52, %v804_v51 }
 0x389   : > { %v783_v14 = vmax.f32 %v769_v18, 0.0  ;;  %v807_v18 = vmul.f32 %v797_v37, %v1804_v35  ;;  %v887_v43 = vmul.f32 %v877_v50, %v1809_v39 }
 0x38a   : > { %v774_v9 = vpop.f32.mrb[14].mxu0  ;;  %1568 = vmatprep.subr.bf16.mxu1 %v1567_v6  ;;  %v784_v22 = vmax.f32 %v771_v8, 0.0  ;;  %v859_v2 = vadd.f32 %v845_v31, %v835_v57  ;;  %v883_v6 = vmul.f32 %v869_v42, %v1809_v39  ;;  %v860_v8 = vadd.f32 %v845_v31, %v836_v61 }
 0x38b   : > { %v775_v11 = vadd.f32 %v774_v9, %v676_v7  ;;  %v776_v15 = vpop.f32.mrb[15].mxu0  ;;  %1570 = vmatpush1.bf16.msra.mxu1 %v1569_v1  ;;  %v933_v56 = vpop.permute.xlu0 %932  ;;  %v838_v1 = vadd.f32 %v830_v54, %v806_v55  ;;  %v884_v9 = vmul.f32 %v869_v42, %v1811_v40 }
 0x38c   : > { %v777_v13 = vadd.f32 %v776_v15, %v676_v7  ;;  %v881_v17 = vpop.permute.xlu1 %880  ;;  %v831_v7 = vmul.f32 %v821_v46, %v1800_v33  ;;  %v832_v15 = vmul.f32 %v821_v46, %v1802_v34  ;;  %v948_v4 = vmul.f32 %v933_v56, %v1832_v60 }
 0x38d   : > { %v785_v16 = vmax.f32 %v775_v11, 0.0  ;;  %v808_v11 = vmul.f32 %v797_v37, %v1806_v36  ;;  %v892_v30 = vadd.f32 %v884_v9, %v860_v8  ;;  %v889_v20 = vmul.f32 %v881_v17, %v1809_v39 }
 0x38e   : > { %v786_v19 = vmax.f32 %v777_v13, 0.0  ;;  %v839_v32 = vadd.f32 %v831_v7, %v807_v18  ;;  %v890_v55 = vmul.f32 %v881_v17, %v1811_v40 }
 0x38f   : > { %v1573_v26 = vpack.c.bf16 %v785_v16, %v783_v14  ;;  %v901_v13 = vpop.permute.xlu0 %900  ;;  %v809_v14 = vmul.f32 %v801_v41, %v1804_v35  ;;  %v833_v16 = vmul.f32 %v825_v23, %v1800_v33  ;;  %v840_v38 = vadd.f32 %v832_v15, %v808_v11 }
 0x390   : > { %v1571_v12 = vpack.c.bf16 %v786_v19, %v784_v22  ;;  %v937_v62 = vpop.permute.xlu1 %936  ;;  %v885_v22 = vmul.f32 %v873_v44, %v1809_v39  ;;  %v861_v19 = vadd.f32 %v849_v0, %v837_v63  ;;  %v915_v25 = vmul.f32 %v901_v13, %v1820_v47 }
 0x391   : > { %v916_v35 = vmul.f32 %v901_v13, %v1822_v48  ;;  %v917_v33 = vmul.f32 %v905_v45, %v1820_v47  ;;  %v841_v42 = vadd.f32 %v833_v16, %v809_v14  ;;  %v864_v46 = vadd.f32 %v853_v49, %v840_v38 }
 0x392   : > { %1572 = vmatprep.subr.bf16.mxu1 %v1571_v12  ;;  %v834_v12 = vmul.f32 %v825_v23, %v1802_v34  ;;  %v893_v31 = vadd.f32 %v885_v22, %v861_v19  ;;  %v863_v23 = vadd.f32 %v853_v49, %v839_v32  ;;  %v950_v57 = vmul.f32 %v937_v62, %v1832_v60 }
 0x393   : > { %1574 = vmatpush1.bf16.msra.mxu1 %v1573_v26  ;;  %v810_v26 = vmul.f32 %v801_v41, %v1806_v36  ;;  %v918_v36 = vmul.f32 %v905_v45, %v1822_v48  ;;  %v924_v5 = vadd.f32 %v916_v35, %v892_v30  ;;  %v865_v52 = vadd.f32 %v857_v3, %v841_v42  ;;  %v913_v61 = vpop.permute.xlu0 %912 }
 0x394   : > { %v949_v45 = vmul.f32 %v937_v62, %v1830_v59  ;;  %v925_v53 = vadd.f32 %v917_v33, %v893_v31  ;;  %v921_v8 = vmul.f32 %v913_v61, %v1820_v47  ;;  %v922_v17 = vmul.f32 %v913_v61, %v1822_v48  ;;  %v1672_v61 = vld [vmem:[%s2097_s1 + $0x8] sm:$0xff] }
 0x395   : > { %v842_v34 = vadd.f32 %v834_v12, %v810_v26  ;;  %v956_v39 = vadd.f32 %v948_v4, %v924_v5  ;;  %v897_v7 = vadd.f32 %v889_v20, %v865_v52  ;;  %v1507_v20 = vld [vmem:[%s2097_s1 + $0xa0] sm:$0xff] }
 0x396   : > { %1528 = vmatmul.mubr.msk.f32.vlgmr.msra.gmra.mrb[8].mxu1 %vm427_vm0, %v1503_v27  ;;  %v886_v27 = vmul.f32 %v873_v44, %v1811_v40  ;;  %v947_v44 = vmul.f32 %v933_v56, %v1830_v59  ;;  %v957_v9 = vadd.f32 %v949_v45, %v925_v53  ;;  %v1508_v45 = vld [vmem:[%s2097_s1 + $0xa8] sm:$0xff]  ;;  %v1509_v53 = vld [vmem:[%s2097_s1 + $0xb0] sm:$0xff] }
 0x397   : > { %1045 = vmatprep.mubr.f32.mxu1 %v1689_v10  ;;  %v866_v54 = vadd.f32 %v857_v3, %v842_v34 }
 0x39a   : > { %1529 = vmatmul.mubr.msk.f32.gmra.mrb[10].mxu1 %vm427_vm0, %v1504_v58  ;;  %v862_v58 = vadd.f32 %v849_v0, %v838_v1  ;;  %v888_v0 = vmul.f32 %v877_v50, %v1811_v40  ;;  %v895_v1 = vadd.f32 %v887_v43, %v863_v23  ;;  %v898_v40 = vadd.f32 %v890_v55, %v866_v54  ;;  %v1510_v54 = vld [vmem:[%s2097_s1 + $0xb8] sm:$0xff] }
 0x39b   : > { %1051 = vmatprep.mubr.f32.mxu1 %v1689_v10  ;;  %v1700_v55 = vmov 16  }
 0x39c   : > { %v894_v41 = vadd.f32 %v886_v27, %v862_v58  ;;  %v929_v58 = vadd.f32 %v921_v8, %v897_v7  ;;  %v930_v32 = vadd.f32 %v922_v17, %v898_v40  ;;  %1668 = vset.pattern.permute.xlu1 %v1700_v55  ;;  %1669 = vset.pattern.permute.xlu0 %v1700_v55 }
 0x39d   : > { %1210 = vperm.xlu0 %1669, %v1672_v61  }
 0x39e   : > { %1530 = vmatmul.mubr.msk.f32.gmra.mrb[12].mxu1 %vm427_vm0, %v1505_v28  ;;  %v909_v28 = vpop.permute.xlu1 %908  ;;  %v926_v49 = vadd.f32 %v918_v36, %v894_v41 }
 0x39f   : > { %1057 = vmatprep.mubr.f32.mxu1 %v1689_v10  ;;  %v919_v50 = vmul.f32 %v909_v28, %v1820_v47  ;;  %v920_v18 = vmul.f32 %v909_v28, %v1822_v48 }
 0x3a0   : > { %v958_v13 = vadd.f32 %v950_v57, %v926_v49  ;;  %v1671_v57 = vld [vmem:[%s2097_s1] sm:$0xff]  ;;  %v1674_v49 = vld [vmem:[%s2097_s1 + $0x18] sm:$0xff] }
 0x3a1   : > { %v927_v14 = vadd.f32 %v919_v50, %v895_v1  ;;  %1206 = vperm.xlu1 %1668, %v1671_v57   ;;  %v1082_v1 = vpop.permute.xlu0 %1081 }
 0x3a2   : > { %1531 = vmatmul.mubr.msk.f32.gmra.mrb[14].mxu1 %vm427_vm0, %v1506_v29  ;;  %v891_v29 = vadd.f32 %v883_v6, %v859_v2  ;;  %v941_v51 = vpop.permute.xlu1 %940  ;;  %v896_v6 = vadd.f32 %v888_v0, %v864_v46 }
 0x3a3   : > { %1297 = vmatprep.mubr.f32.mxu1 %v1689_v10  ;;  %v951_v16 = vmul.f32 %v941_v51, %v1830_v59  ;;  %v952_v12 = vmul.f32 %v941_v51, %v1832_v60 }
 0x3a4   : > { %v923_v37 = vadd.f32 %v915_v25, %v891_v29  ;;  %v928_v26 = vadd.f32 %v920_v18, %v896_v6 }
 0x3a5   : > { %v959_v33 = vadd.f32 %v951_v16, %v927_v14 }
 0x3a6   : > { %v955_v56 = vadd.f32 %v947_v44, %v923_v37  ;;  %v945_v62 = vpop.permute.xlu1 %944  ;;  %v960_v36 = vadd.f32 %v952_v12, %v928_v26 }
 0x3a7   : > { %v953_v47 = vmul.f32 %v945_v62, %v1830_v59  ;;  %v954_v48 = vmul.f32 %v945_v62, %v1832_v60 }
 0x3a9   : > { %v961_v34 = vadd.f32 %v953_v47, %v929_v58  ;;  %v962_v44 = vadd.f32 %v954_v48, %v930_v32 }
 0x469   : > { %v1041_v63 = vpop.f32.mrb[8].mxu1 }
 0x46a   : > { %v1043_v2 = vpop.f32.mrb[9].mxu1  ;;  %v1064_v3 = vadd.f32 %v1041_v63, %v955_v56  ;;  %v1673_v63 = vld [vmem:[%s2097_s1 + $0x10] sm:$0xff] }
 0x46b   : > { %v1065_v11 = vadd.f32 %v1043_v2, %v956_v39  ;;  %1214 = vperm.xlu1 %1668, %v1673_v63   ;;  %v1086_v2 = vpop.permute.xlu1 %1085 }
 0x46c   : > { %v1072_v28 = vmax.f32 %v1064_v3, 0.0 }
 0x46d   : > { %v1047_v15 = vpop.f32.mrb[10].mxu1  ;;  %v1073_v25 = vmax.f32 %v1065_v11, 0.0 }
 0x46e   : > { %v1066_v22 = vadd.f32 %v1047_v15, %v957_v9  ;;  %v1049_v19 = vpop.f32.mrb[11].mxu1 }
 0x46f   : > { %v1067_v27 = vadd.f32 %v1049_v19, %v958_v13  ;;  %1218 = vperm.xlu1 %1668, %v1674_v49   ;;  %v1090_v62 = vpop.permute.xlu1 %1089  ;;  %v1094_v19 = vpop.permute.xlu0 %1093 }
 0x470   : > { %v1074_v29 = vmax.f32 %v1066_v22, 0.0 }
 0x471   : > { %v1075_v30 = vmax.f32 %v1067_v27, 0.0  ;;  %v1053_v38 = vpop.f32.mrb[12].mxu1 }
 0x472   : > { %v1577_v35 = vpack.c.bf16 %v1074_v29, %v1072_v28  ;;  %v1055_v31 = vpop.f32.mrb[13].mxu1  ;;  %v1068_v41 = vadd.f32 %v1053_v38, %v959_v33  ;;  %v1511_v38 = vld [vmem:[%s2097_s1 + $0xc0] sm:$0xff]  ;;  %v1513_v33 = vld [vmem:[%s2097_s1 + $0xd0] sm:$0xff] }
 0x473   : > { %v1575_v42 = vpack.c.bf16 %v1075_v30, %v1073_v25  ;;  %v1069_v23 = vadd.f32 %v1055_v31, %v960_v36  ;;  %v1514_v31 = vld [vmem:[%s2097_s1 + $0xd8] sm:$0xff]  ;;  %v1207_v36 = vpop.permute.xlu1 %1206 }
 0x474   : > { %v1076_v0 = vmax.f32 %v1068_v41, 0.0 }
 0x475   : > { %v1059_v43 = vpop.f32.mrb[14].mxu1  ;;  %1576 = vmatprep.subr.bf16.mxu0 %v1575_v42  ;;  %v1077_v4 = vmax.f32 %v1069_v23, 0.0  ;;  %v1701_v42 = vmov 18   ;;  %v1211_v23 = vpop.permute.xlu0 %1210 }
 0x476   : > { %v1070_v59 = vadd.f32 %v1059_v43, %v961_v34  ;;  %v1061_v37 = vpop.f32.mrb[15].mxu1  ;;  %1578 = vmatpush1.bf16.msra.mxu0 %v1577_v35  ;;  %v1512_v35 = vld [vmem:[%s2097_s1 + $0xc8] sm:$0xff]  ;;  %1670 = vset.pattern.permute.xlu0 %v1701_v42 }
 0x477   : > { %v1071_v46 = vadd.f32 %v1061_v37, %v962_v44  ;;  %1331 = vperm.xlu0 %1670, %v1671_v57  }
 0x478   : > { %v1078_v60 = vmax.f32 %v1070_v59, 0.0 }
 0x479   : > { %v1079_v5 = vmax.f32 %v1071_v46, 0.0 }
 0x47a   : > { %v1581_v51 = vpack.c.bf16 %v1078_v60, %v1076_v0 }
 0x47b   : > { %v1579_v52 = vpack.c.bf16 %v1079_v5, %v1077_v4 }
 0x47d   : > { %1580 = vmatprep.subr.bf16.mxu0 %v1579_v52 }
 0x47e   : > { %1582 = vmatpush1.bf16.msra.mxu0 %v1581_v51 }
 0x481   : > { %1532 = vmatmul.mubr.msk.f32.vlgmr.msra.gmra.mrb[16].mxu0 %vm427_vm0, %v1507_v20 }
 0x482   : > { %1178 = vmatprep.mubr.f32.mxu0 %v1689_v10 }
 0x485   : > { %1533 = vmatmul.mubr.msk.f32.gmra.mrb[18].mxu0 %vm427_vm0, %v1508_v45 }
 0x486   : > { %1184 = vmatprep.mubr.f32.mxu0 %v1689_v10 }
 0x489   : > { %1534 = vmatmul.mubr.msk.f32.gmra.mrb[20].mxu0 %vm427_vm0, %v1509_v53 }
 0x48a   : > { %1190 = vmatprep.mubr.f32.mxu0 %v1689_v10 }
 0x48d   : > { %1535 = vmatmul.mubr.msk.f32.gmra.mrb[22].mxu0 %vm427_vm0, %v1510_v54 }
 0x48e   : > { %1401 = vmatprep.mubr.f32.mxu0 %v1689_v10 }
 0x4ea   : > { %v1215_v0 = vpop.permute.xlu1 %1214 }
 0x4ee   : > { %v1219_v55 = vpop.permute.xlu1 %1218 }
 0x554   : > { %v1174_v50 = vpop.f32.mrb[16].mxu0 }
 0x555   : > { %v1176_v56 = vpop.f32.mrb[17].mxu0  ;;  %v1175_v6 = vadd.f32 %v1174_v50, %v1082_v1 }
 0x556   : > { %v1177_v18 = vadd.f32 %v1176_v56, %v1082_v1 }
 0x557   : > { %v1197_v9 = vmax.f32 %v1175_v6, 0.0 }
 0x558   : > { %v1180_v39 = vpop.f32.mrb[18].mxu0  ;;  %v1198_v17 = vmax.f32 %v1177_v18, 0.0 }
 0x559   : > { %v1181_v7 = vadd.f32 %v1180_v39, %v1086_v2  ;;  %v1182_v8 = vpop.f32.mrb[19].mxu0 }
 0x55a   : > { %v1183_v3 = vadd.f32 %v1182_v8, %v1086_v2  ;;  %v1702_v8 = vmov 1966171168  }
 0x55b   : > { %v1199_v40 = vmax.f32 %v1181_v7, 0.0  ;;  %v1515_v7 = vld [vmem:[%s2097_s1 + $0xe0] sm:$0xff] }
 0x55c   : > { %v1200_v11 = vmax.f32 %v1183_v3, 0.0  ;;  %v1186_v15 = vpop.f32.mrb[20].mxu0  ;;  %v1414_v3 = vunpack.c.l.s4 %v1702_v8 }
 0x55d   : > { %v1585_v13 = vpack.c.bf16 %v1199_v40, %v1197_v9  ;;  %v1188_v14 = vpop.f32.mrb[21].mxu0  ;;  %v1187_v22 = vadd.f32 %v1186_v15, %v1090_v62  ;;  %v1332_v9 = vpop.permute.xlu0 %1331 }
 0x55e   : > { %v1583_v16 = vpack.c.bf16 %v1200_v11, %v1198_v17  ;;  %v1189_v26 = vadd.f32 %v1188_v14, %v1090_v62  ;;  %v1415_v17 = vunpack.c.0.s8 %v1414_v3 }
 0x55f   : > { %v1201_v28 = vmax.f32 %v1187_v22, 0.0 }
 0x560   : > { %v1192_v12 = vpop.f32.mrb[22].mxu0  ;;  %1584 = vmatprep.subr.bf16.mxu1 %v1583_v16  ;;  %v1202_v32 = vmax.f32 %v1189_v26, 0.0  ;;  %v1418_v16 = vsub.s32 %v1415_v17, %v1790_v24 }
 0x561   : > { %v1193_v27 = vadd.f32 %v1192_v12, %v1094_v19  ;;  %v1194_v58 = vpop.f32.mrb[23].mxu0  ;;  %1586 = vmatpush1.bf16.msra.mxu1 %v1585_v13 }
 0x562   : > { %v1195_v47 = vadd.f32 %v1194_v58, %v1094_v19 }
 0x563   : > { %v1203_v29 = vmax.f32 %v1193_v27, 0.0 }
 0x564   : > { %v1204_v48 = vmax.f32 %v1195_v47, 0.0 }
 0x565   : > { %v1589_v25 = vpack.c.bf16 %v1203_v29, %v1201_v28 }
 0x566   : > { %v1587_v30 = vpack.c.bf16 %v1204_v48, %v1202_v32 }
 0x568   : > { %1588 = vmatprep.subr.bf16.mxu1 %v1587_v30 }
 0x569   : > { %1590 = vmatpush1.bf16.msra.mxu1 %v1589_v25 }
 0x56c   : > { %1536 = vmatmul.mubr.msk.f32.vlgmr.msra.gmra.mrb[16].mxu1 %vm427_vm0, %v1511_v38 }
 0x56d   : > { %1303 = vmatprep.mubr.f32.mxu1 %v1689_v10 }
 0x570   : > { %1537 = vmatmul.mubr.msk.f32.gmra.mrb[18].mxu1 %vm427_vm0, %v1512_v35 }
 0x571   : > { %1309 = vmatprep.mubr.f32.mxu1 %v1689_v10 }
 0x574   : > { %1538 = vmatmul.mubr.msk.f32.gmra.mrb[20].mxu1 %vm427_vm0, %v1513_v33 }
 0x575   : > { %1315 = vmatprep.mubr.f32.mxu1 %v1689_v10 }
 0x578   : > { %1539 = vmatmul.mubr.msk.f32.gmra.mrb[22].mxu1 %vm427_vm0, %v1514_v31 }
 0x63f   : > { %v1299_v41 = vpop.f32.mrb[16].mxu1 }
 0x640   : > { %v1301_v34 = vpop.f32.mrb[17].mxu1  ;;  %v1300_v43 = vadd.f32 %v1299_v41, %v1207_v36 }
 0x641   : > { %v1302_v44 = vadd.f32 %v1301_v34, %v1207_v36 }
 0x642   : > { %v1322_v60 = vmax.f32 %v1300_v43, 0.0 }
 0x643   : > { %v1305_v59 = vpop.f32.mrb[18].mxu1  ;;  %v1323_v5 = vmax.f32 %v1302_v44, 0.0 }
 0x644   : > { %v1306_v37 = vadd.f32 %v1305_v59, %v1211_v23  ;;  %v1307_v46 = vpop.f32.mrb[19].mxu1 }
 0x645   : > { %v1308_v10 = vadd.f32 %v1307_v46, %v1211_v23 }
 0x646   : > { %v1324_v4 = vmax.f32 %v1306_v37, 0.0 }
 0x647   : > { %v1325_v51 = vmax.f32 %v1308_v10, 0.0  ;;  %v1311_v52 = vpop.f32.mrb[20].mxu1 }
 0x648   : > { %v1593_v20 = vpack.c.bf16 %v1324_v4, %v1322_v60  ;;  %v1313_v45 = vpop.f32.mrb[21].mxu1  ;;  %v1312_v54 = vadd.f32 %v1311_v52, %v1215_v0 }
 0x649   : > { %v1591_v53 = vpack.c.bf16 %v1325_v51, %v1323_v5  ;;  %v1314_v57 = vadd.f32 %v1313_v45, %v1215_v0 }
 0x64a   : > { %v1326_v50 = vmax.f32 %v1312_v54, 0.0 }
 0x64b   : > { %v1317_v61 = vpop.f32.mrb[22].mxu1  ;;  %1592 = vmatprep.subr.bf16.mxu0 %v1591_v53  ;;  %v1327_v2 = vmax.f32 %v1314_v57, 0.0 }
 0x64c   : > { %v1318_v63 = vadd.f32 %v1317_v61, %v1219_v55  ;;  %v1319_v49 = vpop.f32.mrb[23].mxu1  ;;  %1594 = vmatpush1.bf16.msra.mxu0 %v1593_v20 }
 0x64d   : > { %v1320_v1 = vadd.f32 %v1319_v49, %v1219_v55 }
 0x64e   : > { %v1328_v56 = vmax.f32 %v1318_v63, 0.0 }
 0x64f   : > { %v1329_v6 = vmax.f32 %v1320_v1, 0.0 }
 0x650   : > { %v1597_v18 = vpack.c.bf16 %v1328_v56, %v1326_v50 }
 0x651   : > { %v1595_v39 = vpack.c.bf16 %v1329_v6, %v1327_v2 }
 0x653   : > { %1596 = vmatprep.subr.bf16.mxu0 %v1595_v39 }
 0x654   : > { %1598 = vmatpush1.bf16.msra.mxu0 %v1597_v18 }
 0x657   : > { %1540 = vmatmul.mubr.msk.f32.vlgmr.msra.gmra.mrb[24].mxu0 %vm427_vm0, %v1515_v7 }
 0x72a   : > { %v1403_v40 = vpop.f32.mrb[24].mxu0 }
 0x72b   : > { %v1404_v62 = vadd.f32 %v1403_v40, %v1332_v9  ;;  %v1405_v11 = vpop.f32.mrb[25].mxu0 }
 0x72c   : > { %v1406_v15 = vadd.f32 %v1405_v11, %v1332_v9 }
 0x72d   : > { %v1408_v13 = vmax.f32 %v1404_v62, 0.0 }
 0x72e   : > { %v1409_v14 = vmax.f32 %v1406_v15, 0.0 }
 0x730   : > { %v1412_v22 = vcombine.low %v1408_v13, %v1409_v14 }
 0x732   : > { %v1419_v19 = vrot.slane %v1412_v22, %v1418_v16 }
 0x734   : > { %v1426_v26 = vrot.slane %v1419_v19, %v1418_v16 }
 0x736   : > { %1432 = vst.msk [vmem:[%s143_s4] sm:$0x3] %vm1430_vm1, %v1426_v26 }
 0x737 PF: > { %s12_s9 = sadd.s32 1, %s1681_s9  }
 0x738   : > { %p9_p4 = scmp.ge.s32.totalorder %s12_s9, 6  }
 0x73a   :  { %11 = sbr.rel (!%p9_p4) target bundleno = 1 (0x1), region = 65 }

</bundles_post_ra>
